<compile_context>
chip_gen: v7x
topology: tpu7x:2x2x1
jax: 0.10.0
libtpu: 0.0.40
codegen_flags: <defaults>
</compile_context>

<pallas_src>
import functools

import jax
import jax.numpy as jnp
from jax.experimental import pallas as pl
from jax.experimental.pallas import tpu as pltpu


def _round_up(x, m):
    return ((x + m - 1) // m) * m


def autopad(k, p=None, d=1):
    if d > 1:
        k = d * (k - 1) + 1 if isinstance(k, int) else [d * (x - 1) + 1 for x in k]
    if p is None:
        p = k // 2 if isinstance(k, int) else [x // 2 for x in k]
    return p


# ---------------------------------------------------------------------------
# Pallas kernel: out = SiLU( (sum_t x_taps_t @ W_t) * scale + shift )
# ---------------------------------------------------------------------------
def _conv_bn_silu_kernel(x_ref, w_ref, scale_ref, shift_ref, o_ref, *,
                         k, s, d, Wp, TQ, n_qb):
    # x_ref:     (R_in, C1p)    bf16  full flattened (padded) image, resident
    # w_ref:     (k*k, C1p, TN) bf16  weights for this C2 tile
    # scale_ref: (1, TN) f32    shift_ref: (1, TN) f32
    # o_ref:     (TQ, TN) f32   one output-row block for this C2 tile
    if n_qb > 1:
        q0 = pl.program_id(1) * TQ        # first output row of this block
    else:
        q0 = 0                            # static -> fully static slices

    acc = jnp.zeros(o_ref.shape, jnp.float32)
    for t in range(k * k):
        i, j = t // k, t % k
        off = i * d * Wp + j * d
        if s == 1:
            if n_qb == 1:
                rows = x_ref[off:off + TQ, :]                  # static slice
            else:
                # Keep the dynamic start 8-aligned (q0 is a multiple of 8);
                # apply the sub-8 remainder as a static slice of the window.
                off_al = (off // 8) * 8
                rem = off - off_al
                start = pl.multiple_of(q0 + off_al, 8)
                win = x_ref[pl.ds(start, TQ + 8), :]
                rows = win[rem:rem + TQ, :]
        else:
            # TODO(synk): strided tap gather (s > 1) path is not exercised here.
            rows = x_ref[pl.ds(q0 * s + off, TQ, stride=s), :]
        acc = acc + jnp.dot(rows, w_ref[t],
                            preferred_element_type=jnp.float32)

    y = acc * scale_ref[...] + shift_ref[...]                  # folded bias+BN
    o_ref[...] = (y * jax.nn.sigmoid(y)).astype(o_ref.dtype)   # SiLU


# ---------------------------------------------------------------------------
# Wrapper: layout plumbing + parameter folding + pallas_call
# ---------------------------------------------------------------------------
def conv_forward(x_nchw, params, *, k=3, s=1, p=None, d=1, g=1, eps=1e-5,
                 tq=512, tn=128):
    """Equivalent of Conv.forward(x) = SiLU(BN(Conv2d(x))).  x: NCHW f32."""
    assert g == 1, "grouped conv not supported"
    p = autopad(k, p, d)

    w = params["conv_w"]            # (C2, C1, k, k) PyTorch layout
    b = params.get("conv_b")        # (C2,) or None
    gamma, beta = params["bn_gamma"], params["bn_beta"]
    mean, var = params["bn_mean"], params["bn_var"]

    C2, C1, _, _ = w.shape
    N, _, H, W = x_nchw.shape
    Hp, Wp = H + 2 * p, W + 2 * p
    Ho = (Hp - d * (k - 1) - 1) // s + 1
    Wo = (Wp - d * (k - 1) - 1) // s + 1

    C1p = _round_up(C1, 8)          # sublane-aligned contraction dim
    TN = tn
    C2p = _round_up(C2, TN)         # lane-dense output channels
    Q = Ho * Wp                     # flat output rows (over padded width)
    TQ = min(tq, _round_up(Q, 8))   # big row tiles (mem-bound roofline)
    Qp = _round_up(Q, TQ)
    n_qb = Qp // TQ
    # rows of the flattened input the kernel may touch (+8 alignment slack)
    R_in = s * (Qp - 1) + (k - 1) * d * (Wp + 1) + 1 + 8
    R_in = _round_up(max(R_in, Hp * Wp), 8)

    # ---- input: NCHW -> NHWC, spatial zero-pad, channel pad, flatten, bf16
    x = jnp.transpose(x_nchw, (0, 2, 3, 1))                     # (N, H, W, C1)
    x = jnp.pad(x, ((0, 0), (p, p), (p, p), (0, C1p - C1)))     # (N, Hp, Wp, C1p)
    x = x.reshape(N, Hp * Wp, C1p)
    x = jnp.pad(x, ((0, 0), (0, R_in - Hp * Wp), (0, 0)))
    x = x.astype(jnp.bfloat16)

    # ---- weights: (C2, C1, k, k) -> (k*k, C1p, C2p) bf16 (t = i*k + j)
    w_mat = jnp.transpose(w, (2, 3, 1, 0)).reshape(k * k, C1, C2)
    w_mat = jnp.pad(w_mat, ((0, 0), (0, C1p - C1), (0, C2p - C2)))
    w_mat = w_mat.astype(jnp.bfloat16)

    # ---- fold conv bias + eval-mode BatchNorm into per-channel scale/shift
    inv_std = 1.0 / jnp.sqrt(var.astype(jnp.float32) + eps)
    scale = gamma.astype(jnp.float32) * inv_std
    bias = b.astype(jnp.float32) if b is not None else jnp.zeros((C2,), jnp.float32)
    shift = (bias - mean.astype(jnp.float32)) * scale + beta.astype(jnp.float32)
    scale = jnp.pad(scale, (0, C2p - C2)).reshape(1, C2p)
    shift = jnp.pad(shift, (0, C2p - C2)).reshape(1, C2p)

    n_cb = C2p // TN
    grid = (N, n_qb, n_cb)

    kernel = functools.partial(_conv_bn_silu_kernel,
                               k=k, s=s, d=d, Wp=Wp, TQ=TQ, n_qb=n_qb)

    cost = pl.CostEstimate(
        flops=2 * N * Qp * C1p * C2p * k * k,
        transcendentals=N * Qp * C2p,
        bytes_accessed=(x.size * 2 + w_mat.size * 2
                        + (scale.size + shift.size) * 4
                        + N * Qp * C2p * 4),
    )

    out = pl.pallas_call(
        kernel,
        out_shape=jax.ShapeDtypeStruct((N, Qp, C2p), jnp.float32),
        grid_spec=pltpu.PrefetchScalarGridSpec(
            num_scalar_prefetch=0,
            grid=grid,
            in_specs=[
                pl.BlockSpec((None, R_in, C1p), lambda n, q, c: (n, 0, 0)),
                pl.BlockSpec((k * k, C1p, TN), lambda n, q, c: (0, 0, c)),
                pl.BlockSpec((1, TN), lambda n, q, c: (0, c)),
                pl.BlockSpec((1, TN), lambda n, q, c: (0, c)),
            ],
            out_specs=pl.BlockSpec((None, TQ, TN), lambda n, q, c: (n, q, c)),
        ),
        compiler_params=pltpu.CompilerParams(
            dimension_semantics=("parallel", "parallel", "parallel"),
            vmem_limit_bytes=48 * 1024 * 1024,
        ),
        cost_estimate=cost,
    )(x, w_mat, scale, shift)

    # unflatten: (N, Qp, C2p) -> (N, Ho, Wo, C2) -> NCHW
    out = out[:, :Ho * Wp, :C2].reshape(N, Ho, Wp, C2)[:, :, :Wo, :]
    # TODO(synk): keep NHWC (skip this transpose) when chaining Conv layers.
    return jnp.transpose(out, (0, 3, 1, 2))


# ---------------------------------------------------------------------------
# Reference (pure JAX, f32) for a correctness check
# ---------------------------------------------------------------------------
def conv_reference(x_nchw, params, *, k=3, s=1, p=None, d=1, eps=1e-5):
    p = autopad(k, p, d)
    y = jax.lax.conv_general_dilated(
        x_nchw, params["conv_w"],
        window_strides=(s, s), padding=[(p, p), (p, p)],
        rhs_dilation=(d, d),
        dimension_numbers=("NCHW", "OIHW", "NCHW"),
    ) + params["conv_b"][None, :, None, None]
    inv_std = 1.0 / jnp.sqrt(params["bn_var"] + eps)
    y = (y - params["bn_mean"][None, :, None, None]) * \
        (params["bn_gamma"] * inv_std)[None, :, None, None] + \
        params["bn_beta"][None, :, None, None]
    return y * jax.nn.sigmoid(y)


# ---------------------------------------------------------------------------
if __name__ == "__main__":
    key = jax.random.PRNGKey(0)
    kx, kw, kb, kg, kbe, km, kv = jax.random.split(key, 7)

    # Small shapes consistent with the module: c1=4, c2=8, k=3, s=1.
    N, C1, H, W = 2, 4, 16, 16
    C2, K = 8, 3

    x = jax.random.normal(kx, (N, C1, H, W), dtype=jnp.float32)

    params = {
        "conv_w": jax.random.normal(kw, (C2, C1, K, K), dtype=jnp.float32) * 0.1,
        "conv_b": jax.random.normal(kb, (C2,), dtype=jnp.float32) * 0.1,
        "bn_gamma": 1.0 + 0.1 * jax.random.normal(kg, (C2,), dtype=jnp.float32),
        "bn_beta": 0.1 * jax.random.normal(kbe, (C2,), dtype=jnp.float32),
        "bn_mean": 0.1 * jax.random.normal(km, (C2,), dtype=jnp.float32),
        "bn_var": jnp.abs(1.0 + 0.1 * jax.random.normal(kv, (C2,), dtype=jnp.float32)),
    }

    fwd = jax.jit(functools.partial(conv_forward, k=K, s=1))
    out = fwd(x, params)
    jax.block_until_ready(out)

    ref = conv_reference(x, params, k=K, s=1)
    assert out.shape == (N, C2, H, W), out.shape
    max_err = float(jnp.max(jnp.abs(out - ref)))
    # bf16 operands with f32 accumulation -> looser tolerance than pure f32.
    assert max_err < 5e-2, max_err

    print("KERNEL_OK")
</pallas_src>

<mosaic_0001>
module attributes {stable_mosaic.version = 11 : i64} {
  func.func @_conv_bn_silu_kernel(%arg0: i32, %arg1: i32, %arg2: i32, %arg3: memref<1x336x8xbf16, #tpu.memory_space<vmem>>, %arg4: memref<9x8x128xbf16, #tpu.memory_space<vmem>>, %arg5: memref<1x128xf32, #tpu.memory_space<vmem>>, %arg6: memref<1x128xf32, #tpu.memory_space<vmem>>, %arg7: memref<1x288x128xf32, #tpu.memory_space<vmem>>) attributes {dimension_semantics = [#tpu.dimension_semantics<parallel>, #tpu.dimension_semantics<parallel>, #tpu.dimension_semantics<parallel>], iteration_bounds = array<i64: 2, 1, 1>, scalar_prefetch = 0 : i64, scratch_operands = 0 : i64, tpu.core_type = #tpu.core_type<tc>, window_params = [{transform_indices = @transform_0, window_bounds = array<i64: 1, 336, 8>}, {transform_indices = @transform_1, window_bounds = array<i64: 9, 8, 128>}, {transform_indices = @transform_2, window_bounds = array<i64: 1, 128>}, {transform_indices = @transform_3, window_bounds = array<i64: 1, 128>}, {transform_indices = @transform_4, window_bounds = array<i64: 1, 288, 128>}]} {
    %cst = arith.constant 0.000000e+00 : f32
    %0 = vector.broadcast %cst : f32 to vector<288x128xf32>
    %c0 = arith.constant 0 : index
    %c0_0 = arith.constant 0 : index
    %c0_1 = arith.constant 0 : index
    %1 = vector.load %arg3[%c0, %c0_0, %c0_1] : memref<1x336x8xbf16, #tpu.memory_space<vmem>>, vector<1x288x8xbf16>
    %2 = vector.shape_cast %1 : vector<1x288x8xbf16> to vector<288x8xbf16>
    %c0_2 = arith.constant 0 : index
    %c0_3 = arith.constant 0 : index
    %c0_4 = arith.constant 0 : index
    %3 = vector.load %arg4[%c0_2, %c0_3, %c0_4] : memref<9x8x128xbf16, #tpu.memory_space<vmem>>, vector<1x8x128xbf16>
    %4 = vector.shape_cast %3 : vector<1x8x128xbf16> to vector<8x128xbf16>
    %cst_5 = arith.constant dense<0.000000e+00> : vector<288x128xf32>
    %5 = tpu.matmul %2, %4, %cst_5 {dimension_numbers = #tpu.dot_dimension_numbers<[1], [0], [0], [1], [0, 0, 1, 1], [], []>} : vector<288x8xbf16>, vector<8x128xbf16>, vector<288x128xf32> -> vector<288x128xf32>
    %6 = arith.addf %0, %5 : vector<288x128xf32>
    %c0_6 = arith.constant 0 : index
    %c1 = arith.constant 1 : index
    %c0_7 = arith.constant 0 : index
    %7 = vector.load %arg3[%c0_6, %c1, %c0_7] : memref<1x336x8xbf16, #tpu.memory_space<vmem>>, vector<1x288x8xbf16>
    %8 = vector.shape_cast %7 : vector<1x288x8xbf16> to vector<288x8xbf16>
    %c1_8 = arith.constant 1 : index
    %c0_9 = arith.constant 0 : index
    %c0_10 = arith.constant 0 : index
    %9 = vector.load %arg4[%c1_8, %c0_9, %c0_10] : memref<9x8x128xbf16, #tpu.memory_space<vmem>>, vector<1x8x128xbf16>
    %10 = vector.shape_cast %9 : vector<1x8x128xbf16> to vector<8x128xbf16>
    %cst_11 = arith.constant dense<0.000000e+00> : vector<288x128xf32>
    %11 = tpu.matmul %8, %10, %cst_11 {dimension_numbers = #tpu.dot_dimension_numbers<[1], [0], [0], [1], [0, 0, 1, 1], [], []>} : vector<288x8xbf16>, vector<8x128xbf16>, vector<288x128xf32> -> vector<288x128xf32>
    %12 = arith.addf %6, %11 : vector<288x128xf32>
    %c0_12 = arith.constant 0 : index
    %c2 = arith.constant 2 : index
    %c0_13 = arith.constant 0 : index
    %13 = vector.load %arg3[%c0_12, %c2, %c0_13] : memref<1x336x8xbf16, #tpu.memory_space<vmem>>, vector<1x288x8xbf16>
    %14 = vector.shape_cast %13 : vector<1x288x8xbf16> to vector<288x8xbf16>
    %c2_14 = arith.constant 2 : index
    %c0_15 = arith.constant 0 : index
    %c0_16 = arith.constant 0 : index
    %15 = vector.load %arg4[%c2_14, %c0_15, %c0_16] : memref<9x8x128xbf16, #tpu.memory_space<vmem>>, vector<1x8x128xbf16>
    %16 = vector.shape_cast %15 : vector<1x8x128xbf16> to vector<8x128xbf16>
    %cst_17 = arith.constant dense<0.000000e+00> : vector<288x128xf32>
    %17 = tpu.matmul %14, %16, %cst_17 {dimension_numbers = #tpu.dot_dimension_numbers<[1], [0], [0], [1], [0, 0, 1, 1], [], []>} : vector<288x8xbf16>, vector<8x128xbf16>, vector<288x128xf32> -> vector<288x128xf32>
    %18 = arith.addf %12, %17 : vector<288x128xf32>
    %c0_18 = arith.constant 0 : index
    %c18 = arith.constant 18 : index
    %c0_19 = arith.constant 0 : index
    %19 = vector.load %arg3[%c0_18, %c18, %c0_19] : memref<1x336x8xbf16, #tpu.memory_space<vmem>>, vector<1x288x8xbf16>
    %20 = vector.shape_cast %19 : vector<1x288x8xbf16> to vector<288x8xbf16>
    %c3 = arith.constant 3 : index
    %c0_20 = arith.constant 0 : index
    %c0_21 = arith.constant 0 : index
    %21 = vector.load %arg4[%c3, %c0_20, %c0_21] : memref<9x8x128xbf16, #tpu.memory_space<vmem>>, vector<1x8x128xbf16>
    %22 = vector.shape_cast %21 : vector<1x8x128xbf16> to vector<8x128xbf16>
    %cst_22 = arith.constant dense<0.000000e+00> : vector<288x128xf32>
    %23 = tpu.matmul %20, %22, %cst_22 {dimension_numbers = #tpu.dot_dimension_numbers<[1], [0], [0], [1], [0, 0, 1, 1], [], []>} : vector<288x8xbf16>, vector<8x128xbf16>, vector<288x128xf32> -> vector<288x128xf32>
    %24 = arith.addf %18, %23 : vector<288x128xf32>
    %c0_23 = arith.constant 0 : index
    %c19 = arith.constant 19 : index
    %c0_24 = arith.constant 0 : index
    %25 = vector.load %arg3[%c0_23, %c19, %c0_24] : memref<1x336x8xbf16, #tpu.memory_space<vmem>>, vector<1x288x8xbf16>
    %26 = vector.shape_cast %25 : vector<1x288x8xbf16> to vector<288x8xbf16>
    %c4 = arith.constant 4 : index
    %c0_25 = arith.constant 0 : index
    %c0_26 = arith.constant 0 : index
    %27 = vector.load %arg4[%c4, %c0_25, %c0_26] : memref<9x8x128xbf16, #tpu.memory_space<vmem>>, vector<1x8x128xbf16>
    %28 = vector.shape_cast %27 : vector<1x8x128xbf16> to vector<8x128xbf16>
    %cst_27 = arith.constant dense<0.000000e+00> : vector<288x128xf32>
    %29 = tpu.matmul %26, %28, %cst_27 {dimension_numbers = #tpu.dot_dimension_numbers<[1], [0], [0], [1], [0, 0, 1, 1], [], []>} : vector<288x8xbf16>, vector<8x128xbf16>, vector<288x128xf32> -> vector<288x128xf32>
    %30 = arith.addf %24, %29 : vector<288x128xf32>
    %c0_28 = arith.constant 0 : index
    %c20 = arith.constant 20 : index
    %c0_29 = arith.constant 0 : index
    %31 = vector.load %arg3[%c0_28, %c20, %c0_29] : memref<1x336x8xbf16, #tpu.memory_space<vmem>>, vector<1x288x8xbf16>
    %32 = vector.shape_cast %31 : vector<1x288x8xbf16> to vector<288x8xbf16>
    %c5 = arith.constant 5 : index
    %c0_30 = arith.constant 0 : index
    %c0_31 = arith.constant 0 : index
    %33 = vector.load %arg4[%c5, %c0_30, %c0_31] : memref<9x8x128xbf16, #tpu.memory_space<vmem>>, vector<1x8x128xbf16>
    %34 = vector.shape_cast %33 : vector<1x8x128xbf16> to vector<8x128xbf16>
    %cst_32 = arith.constant dense<0.000000e+00> : vector<288x128xf32>
    %35 = tpu.matmul %32, %34, %cst_32 {dimension_numbers = #tpu.dot_dimension_numbers<[1], [0], [0], [1], [0, 0, 1, 1], [], []>} : vector<288x8xbf16>, vector<8x128xbf16>, vector<288x128xf32> -> vector<288x128xf32>
    %36 = arith.addf %30, %35 : vector<288x128xf32>
    %c0_33 = arith.constant 0 : index
    %c36 = arith.constant 36 : index
    %c0_34 = arith.constant 0 : index
    %37 = vector.load %arg3[%c0_33, %c36, %c0_34] : memref<1x336x8xbf16, #tpu.memory_space<vmem>>, vector<1x288x8xbf16>
    %38 = vector.shape_cast %37 : vector<1x288x8xbf16> to vector<288x8xbf16>
    %c6 = arith.constant 6 : index
    %c0_35 = arith.constant 0 : index
    %c0_36 = arith.constant 0 : index
    %39 = vector.load %arg4[%c6, %c0_35, %c0_36] : memref<9x8x128xbf16, #tpu.memory_space<vmem>>, vector<1x8x128xbf16>
    %40 = vector.shape_cast %39 : vector<1x8x128xbf16> to vector<8x128xbf16>
    %cst_37 = arith.constant dense<0.000000e+00> : vector<288x128xf32>
    %41 = tpu.matmul %38, %40, %cst_37 {dimension_numbers = #tpu.dot_dimension_numbers<[1], [0], [0], [1], [0, 0, 1, 1], [], []>} : vector<288x8xbf16>, vector<8x128xbf16>, vector<288x128xf32> -> vector<288x128xf32>
    %42 = arith.addf %36, %41 : vector<288x128xf32>
    %c0_38 = arith.constant 0 : index
    %c37 = arith.constant 37 : index
    %c0_39 = arith.constant 0 : index
    %43 = vector.load %arg3[%c0_38, %c37, %c0_39] : memref<1x336x8xbf16, #tpu.memory_space<vmem>>, vector<1x288x8xbf16>
    %44 = vector.shape_cast %43 : vector<1x288x8xbf16> to vector<288x8xbf16>
    %c7 = arith.constant 7 : index
    %c0_40 = arith.constant 0 : index
    %c0_41 = arith.constant 0 : index
    %45 = vector.load %arg4[%c7, %c0_40, %c0_41] : memref<9x8x128xbf16, #tpu.memory_space<vmem>>, vector<1x8x128xbf16>
    %46 = vector.shape_cast %45 : vector<1x8x128xbf16> to vector<8x128xbf16>
    %cst_42 = arith.constant dense<0.000000e+00> : vector<288x128xf32>
    %47 = tpu.matmul %44, %46, %cst_42 {dimension_numbers = #tpu.dot_dimension_numbers<[1], [0], [0], [1], [0, 0, 1, 1], [], []>} : vector<288x8xbf16>, vector<8x128xbf16>, vector<288x128xf32> -> vector<288x128xf32>
    %48 = arith.addf %42, %47 : vector<288x128xf32>
    %c0_43 = arith.constant 0 : index
    %c38 = arith.constant 38 : index
    %c0_44 = arith.constant 0 : index
    %49 = vector.load %arg3[%c0_43, %c38, %c0_44] : memref<1x336x8xbf16, #tpu.memory_space<vmem>>, vector<1x288x8xbf16>
    %50 = vector.shape_cast %49 : vector<1x288x8xbf16> to vector<288x8xbf16>
    %c8 = arith.constant 8 : index
    %c0_45 = arith.constant 0 : index
    %c0_46 = arith.constant 0 : index
    %51 = vector.load %arg4[%c8, %c0_45, %c0_46] : memref<9x8x128xbf16, #tpu.memory_space<vmem>>, vector<1x8x128xbf16>
    %52 = vector.shape_cast %51 : vector<1x8x128xbf16> to vector<8x128xbf16>
    %cst_47 = arith.constant dense<0.000000e+00> : vector<288x128xf32>
    %53 = tpu.matmul %50, %52, %cst_47 {dimension_numbers = #tpu.dot_dimension_numbers<[1], [0], [0], [1], [0, 0, 1, 1], [], []>} : vector<288x8xbf16>, vector<8x128xbf16>, vector<288x128xf32> -> vector<288x128xf32>
    %54 = arith.addf %48, %53 : vector<288x128xf32>
    %c0_48 = arith.constant 0 : index
    %c0_49 = arith.constant 0 : index
    %55 = vector.load %arg5[%c0_48, %c0_49] : memref<1x128xf32, #tpu.memory_space<vmem>>, vector<1x128xf32>
    %56 = vector.broadcast %55 : vector<1x128xf32> to vector<288x128xf32>
    %57 = arith.mulf %54, %56 : vector<288x128xf32>
    %c0_50 = arith.constant 0 : index
    %c0_51 = arith.constant 0 : index
    %58 = vector.load %arg6[%c0_50, %c0_51] : memref<1x128xf32, #tpu.memory_space<vmem>>, vector<1x128xf32>
    %59 = vector.broadcast %58 : vector<1x128xf32> to vector<288x128xf32>
    %60 = arith.addf %57, %59 : vector<288x128xf32>
    %61 = arith.negf %60 : vector<288x128xf32>
    %62 = math.exp %61 : vector<288x128xf32>
    %cst_52 = arith.constant 1.000000e+00 : f32
    %63 = vector.broadcast %cst_52 : f32 to vector<288x128xf32>
    %64 = arith.addf %63, %62 : vector<288x128xf32>
    %65 = arith.divf %63, %64 : vector<288x128xf32>
    %66 = arith.mulf %60, %65 : vector<288x128xf32>
    %c0_53 = arith.constant 0 : index
    %c0_54 = arith.constant 0 : index
    %c0_55 = arith.constant 0 : index
    %67 = vector.load %arg7[%c0_53, %c0_54, %c0_55] : memref<1x288x128xf32, #tpu.memory_space<vmem>>, vector<1x288x128xf32>
    %68 = vector.shape_cast %67 : vector<1x288x128xf32> to vector<288x128xf32>
    %69 = vector.shape_cast %66 : vector<288x128xf32> to vector<1x288x128xf32>
    tpu.vector_store %arg7[%c0_53, %c0_54, %c0_55], %69 {strides = array<i32>} : memref<1x288x128xf32, #tpu.memory_space<vmem>>, vector<1x288x128xf32>,
    return
  }
  func.func @transform_0(%arg0: i32, %arg1: i32, %arg2: i32) -> (i32, i32, i32) {
    %c0_i32 = arith.constant 0 : i32
    %c0_i32_0 = arith.constant 0 : i32
    %c0_i32_1 = arith.constant 0 : i32
    return %arg0, %c0_i32, %c0_i32_0 : i32, i32, i32
  }
  func.func @transform_1(%arg0: i32, %arg1: i32, %arg2: i32) -> (i32, i32, i32) {
    %c0_i32 = arith.constant 0 : i32
    %c0_i32_0 = arith.constant 0 : i32
    %c0_i32_1 = arith.constant 0 : i32
    return %c0_i32, %c0_i32_0, %arg2 : i32, i32, i32
  }
  func.func @transform_2(%arg0: i32, %arg1: i32, %arg2: i32) -> (i32, i32) {
    %c0_i32 = arith.constant 0 : i32
    %c0_i32_0 = arith.constant 0 : i32
    return %c0_i32, %arg2 : i32, i32
  }
  func.func @transform_3(%arg0: i32, %arg1: i32, %arg2: i32) -> (i32, i32) {
    %c0_i32 = arith.constant 0 : i32
    %c0_i32_0 = arith.constant 0 : i32
    return %c0_i32, %arg2 : i32, i32
  }
  func.func @transform_4(%arg0: i32, %arg1: i32, %arg2: i32) -> (i32, i32, i32) {
    %c0_i32 = arith.constant 0 : i32
    return %arg0, %arg1, %arg2 : i32, i32, i32
  }
}

</mosaic_0001>

<bundles_post_ra>
// kernel: conv_forward.1
= control target key start
LH: loop header
LB: loop body
LE: loop exit
PB: predicated region body
PF: predicated region fallthrough
CT: control target
= control target key end

     0   :  { %s5624_s15 = smov 0   ;;  %s5626_s16 = smov 0   ;;  %s6803_s0 = inlined_call_operand.vmem [shape: bf16[2,336,8], index: 0, kind: input, shape index: {}]   ;;  %s6804_s1 = inlined_call_operand.vmem [shape: bf16[9,8,128], index: 1, kind: input, shape index: {}]   ;;  %s6805_s2 = inlined_call_operand.vmem [shape: f32[1,128], index: 2, kind: input, shape index: {}]   ;;  %s6806_s3 = inlined_call_operand.vmem [shape: f32[1,128], index: 3, kind: input, shape index: {}]   ;;  %s6807_s4 = inlined_call_operand.vmem [shape: f32[2,288,128], index: 4, kind: output, shape index: {}]  }
   0x1   :  { %s5628_s17 = smov 0  }
   0x2 LB: > { %s33_s18 = sadd.s32 1, %s5593_s16  ;;  %p4244_p0 = scmp.ge.s32.totalorder %s5597_s17, 1  ;;  %s5597_s17 = sphi %s5628_s17, %s14_s17   ;;  %s5593_s16 = sphi %s5626_s16, %s6809_s16   ;;  %s5589_s15 = sphi %s5624_s15, %s6808_s15  }
   0x3   : > { %p35_p1 = scmp.ge.s32.totalorder %s33_s18, 2  ;;  %p210_p2 = scmp.lt.s32.totalorder %s5597_s17, 3 }
   0x5   : > { %s6811_s18 = smov (%p35_p1, %s33_s18), 0  ;;  %p211_p3 = pnand %p4244_p0, %p210_p2 }
   0x6   : > { %vm619_vm0 = vcmask (!%p211_p3), 1043456   ;;  %v4361_v0 = vld [vmem:[%s6804_s1 + $0x10] sm:$0xf] (!%p211_p3)  ;;  %v4247_v1 = vld [vmem:[%s6804_s1 + $0x4] sm:$0xf] (!%p211_p3)  ;;  %p253_p4 = scmp.lt.s32.totalorder (!%p211_p3), %s5589_s15, 1 }
   0x7   : > { %214 = sbr.rel (%p211_p3) target bundleno = 606 (0x25e), region = 36  ;;  %5326 = vmatprep.subr.msk.bf16.mxu0 (!%p211_p3), %vm619_vm0, %v4361_v0  ;;  %5322 = vmatprep.subr.msk.bf16.mxu1 (!%p211_p3), %vm619_vm0, %v4247_v1  ;;  %v5651_v2 = vsel (!%p211_p3), %vm619_vm0, %v4361_v0, 0  ;;  %v621_v3 = vsel (!%p211_p3), %vm619_vm0, %v4247_v1, 0  ;;  %v4381_v4 = vld [vmem:[%s6804_s1 + $0x14] sm:$0xf] (!%p211_p3)  ;;  %vm564_vm2 = vcmask (!%p211_p3), 64512  }
   0x8   : > { %4843 = vmatpush3.bf16.msra.mxu0 (!%p211_p3), %v5651_v2  ;;  %4691 = vmatpush3.bf16.msra.mxu1 (!%p211_p3), %v621_v3  ;;  %v318_v5 = vld [vmem:[%s6804_s1] sm:$0xf] (!%p211_p3)  ;;  %vm415_vm1 = vsmask.f32 (!%p211_p3), 7424  ;;  %v5672_v6 = vsel (!%p211_p3), %vm619_vm0, %v4381_v4, 0  ;;  %vm2222_vm4 = vcmask (!%p211_p3), 1045504  }
   0x9   : > { %5328 = vmatprep.subr.msk.bf16.mxu0 (!%p211_p3), %vm619_vm0, %v4381_v4  ;;  %5323 = vmatprep.subr.msk.bf16.mxu1 (!%p211_p3), %vm619_vm0, %v318_v5  ;;  %vm1775_vm3 = vsmask.f32 (!%p211_p3), 6400  ;;  %v837_v12 = vsel (!%p211_p3), %vm619_vm0, %v318_v5, 0  ;;  %v5720_v39 = vld [vmem:[%s6804_s1 + $0x8] sm:$0xf] (!%p211_p3)  ;;  %vm1022_vm5 = vcmask (!%p211_p3), 1046528  }
   0xa   : > { %v5754_v1 = vld [vmem:[%s6804_s1 + $0x18] sm:$0xf] (!%p211_p3)  ;;  %vm2975_vm6 = vsmask.f32 (!%p211_p3), 5376  ;;  %vm3422_vm7 = vcmask (!%p211_p3), 1044480  }
   0xe   : > { %s6813_s15 = smov (!%p253_p4, %s5589_s15), 1 }
   0xf   : > { %s5332_s27 = smul.u32 168, %s6813_s15 }
  0x10   : > { %s5333_s25 = smul.u32 288, %s6813_s15 }
  0x11   : > { %s5669_s30 = scalar_lea.vmem %s6803_s0, %s5332_s27 }
  0x12   : > { %v282_v7 = vld [vmem:[%s5669_s30] sm:$0xf]  ;;  %v5676_v8 = vld [vmem:[%s5669_s30 + $0x4] sm:$0xf]  ;;  %v5682_v10 = vld [vmem:[%s5669_s30 + $0x8] sm:$0xff]   ;;  %s6570_s27 = scalar_lea.vmem %s6807_s4, %s5333_s25 }
  0x13   : > { %v5679_v9 = vcombine.low %v282_v7, %v5676_v8  ;;  %v1330_v11 = vld [vmem:[%s5669_s30 + $0x8] sm:$0xe]  ;;  %v5687_v13 = vld [vmem:[%s5669_s30 + $0xc] sm:$0xf]  ;;  %v424_v16 = vshll.u32 %v5682_v10, 16  ;;  %v428_v17 = vshrl.u32 %v5682_v10, 16 }
  0x14   : > { %v5694_v18 = vld [vmem:[%s5669_s30 + $0x10] sm:$0xff]   ;;  %v5700_v20 = vcombine.low %v1330_v11, %v5687_v13  ;;  %v5708_v28 = vld [vmem:[%s5669_s30 + $0x18] sm:$0xff]   ;;  %v5714_v34 = vld [vmem:[%s5669_s30 + $0x20] sm:$0xff]  }
  0x15   : > { %v417_v14 = vshrl.u32 %v5679_v9, 16  ;;  %v419_v15 = vshll.u32 %v5679_v9, 16  ;;  %v5697_v19 = vld [vmem:[%s5669_s30 + $0x10] sm:$0xff]   ;;  %v426_v22 = vrot.slane %v424_v16, 1  ;;  %v1785_v23 = vshrl.u32 %v5694_v18, 16  ;;  %v5711_v33 = vld [vmem:[%s5669_s30 + $0x18] sm:$0xff]  }
  0x16   : > { %v1788_v24 = vshll.u32 %v5694_v18, 16  ;;  %v1777_v25 = vshrl.u32 %v5700_v20, 16  ;;  %v1780_v26 = vshll.u32 %v5700_v20, 16  ;;  %v432_v27 = vshll.u32 %v5697_v19, 16  ;;  %v5729_v48 = vld [vmem:[%s5669_s30 + $0x20] sm:$0xff]   ;;  %v5732_v49 = vld [vmem:[%s5669_s30 + $0x28] sm:$0xff]  }
  0x17   : > { %v421_v21 = vrot.slane %v419_v15, 1  ;;  %v430_v30 = vor.u32 %v428_v17, %v426_v22  ;;  %v1787_v31 = vrot.slane %v1785_v23, 1  ;;  %v1794_v38 = vshrl.u32 %v5708_v28, 16  ;;  %v5738_v54 = vld [vmem:[%s5669_s30 + $0x28] sm:$0xff]   ;;  %v5744_v59 = vld [vmem:[%s5669_s30 + $0x30] sm:$0xff]   ;;  %v5768_v23 = vld [vmem:[%s5669_s30 + $0x38] sm:$0xff]  }
  0x18   : > { %v1790_v32 = vrot.slane %v1788_v24, 2  ;;  %v1779_v35 = vrot.slane %v1777_v25, 1  ;;  %v1782_v36 = vrot.slane %v1780_v26, 2  ;;  %v434_v37 = vrot.slane %v432_v27, 1  ;;  %v5749_v0 = vld [vmem:[%s5669_s30 + $0x30] sm:$0xff]  }
  0x19   : > { %v422_v29 = vor.u32 %v421_v21, %v417_v14  ;;  %v1797_v42 = vshll.u32 %v5708_v28, 16  ;;  %v436_v43 = vshrl.u32 %v5697_v19, 16  ;;  %v1796_v46 = vrot.slane %v1794_v38, 1 }
  0x1a   : > { %v1791_v41 = vor.u32 %v1790_v32, %v1787_v31  ;;  %v1783_v44 = vor.u32 %v1782_v36, %v1779_v35  ;;  %v435_v45 = vsel %vm415_vm1, %v430_v30, %v434_v37  ;;  %v440_v47 = vshll.u32 %v5711_v33, 16  ;;  %v5777_v35 = vld [vmem:[%s5669_s30 + $0x38] sm:$0xff]  }
  0x1b   : > { %v427_v40 = vsel %vm415_vm1, %v422_v29, %v426_v22  ;;  %v1799_v50 = vrot.slane %v1797_v42, 2  ;;  %v438_v51 = vor.u32 %v436_v43, %v434_v37  ;;  %v1803_v52 = vshrl.u32 %v5714_v34, 16 }
  0x1c   : > { %4692 = vmatprep.mubr.msk.bf16.mxu1 %vm564_vm2, %v427_v40  ;;  %v1806_v53 = vshll.u32 %v5714_v34, 16  ;;  %v1792_v55 = vsel %vm1775_vm3, %v1783_v44, %v1791_v41  ;;  %v442_v56 = vrot.slane %v440_v47, 1  ;;  %v444_v57 = vshrl.u32 %v5711_v33, 16  ;;  %v5788_v44 = vld [vmem:[%s5669_s30 + $0x40] sm:$0xff]  }
  0x1d   : > { %4693 = vmatmul.mubr.msk.bf16.vlgmr.msra.gmra.mrb[0].mxu1 %vm564_vm2, %v435_v45  ;;  %v448_v58 = vshll.u32 %v5729_v48, 16  ;;  %4844 = vmatprep.mubr.msk.bf16.mxu0 %vm564_vm2, %v1792_v55  ;;  %v1800_v60 = vor.u32 %v1799_v50, %v1796_v46  ;;  %v1805_v61 = vrot.slane %v1803_v52, 1  ;;  %v1812_v63 = vshrl.u32 %v5732_v49, 16 }
  0x1e   : > { %4729 = vmatpush3.bf16.msra.mxu1 %v837_v12  ;;  %v1808_v62 = vrot.slane %v1806_v53, 2  ;;  %v443_v3 = vsel %vm415_vm1, %v438_v51, %v442_v56  ;;  %v446_v4 = vor.u32 %v444_v57, %v442_v56  ;;  %v1815_v7 = vshll.u32 %v5732_v49, 16  ;;  %v5793_v51 = vld [vmem:[%s5669_s30 + $0x40] sm:$0xff]  }
  0x1f   : > { %5324 = vmatprep.subr.msk.bf16.mxu1 %vm619_vm0, %v5720_v39  ;;  %v450_v5 = vrot.slane %v448_v58, 1  ;;  %v1801_v11 = vsel %vm1775_vm3, %v1791_v41, %v1800_v60  ;;  %4696 = vmatprep.mubr.msk.bf16.mxu1 %vm564_vm2, %v443_v3  ;;  %v1814_v14 = vrot.slane %v1812_v63, 1  ;;  %v452_v15 = vshrl.u32 %v5729_v48, 16  ;;  %v5804_v63 = vld [vmem:[%s5669_s30 + $0x48] sm:$0xff]  }
  0x20   : > { %v1809_v12 = vor.u32 %v1808_v62, %v1805_v61  ;;  %4845 = vmatmul.mubr.msk.bf16.vlgmr.msra.gmra.mrb[0].mxu0 %vm564_vm2, %v1801_v11  ;;  %v1817_v17 = vrot.slane %v1815_v7, 2  ;;  %v456_v21 = vshll.u32 %v5738_v54, 16  ;;  %v1821_v22 = vshrl.u32 %v5744_v59, 16  ;;  %v5801_v62 = vld [vmem:[%s5669_s30 + $0x48] sm:$0xff]  }
  0x21   : > { %v451_v16 = vsel %vm415_vm1, %v446_v4, %v450_v5  ;;  %4881 = vmatpush3.bf16.msra.mxu0 %v5672_v6  ;;  %v454_v25 = vor.u32 %v452_v15, %v450_v5  ;;  %v1824_v26 = vshll.u32 %v5744_v59, 16  ;;  %v460_v27 = vshrl.u32 %v5738_v54, 16 }
  0x22   : > { %v1810_v24 = vsel %vm1775_vm3, %v1800_v60, %v1809_v12  ;;  %v1818_v29 = vor.u32 %v1817_v17, %v1814_v14  ;;  %v458_v30 = vrot.slane %v456_v21, 1  ;;  %v1823_v31 = vrot.slane %v1821_v22, 1  ;;  %5329 = vmatprep.subr.msk.bf16.mxu0 %vm619_vm0, %v5754_v1  ;;  %v5813_v14 = vld [vmem:[%s5669_s30 + $0x50] sm:$0xff]  }
  0x23   : > { %4848 = vmatprep.mubr.msk.bf16.mxu0 %vm564_vm2, %v1810_v24  ;;  %v464_v32 = vshll.u32 %v5749_v0, 16  ;;  %v1826_v6 = vrot.slane %v1824_v26, 2  ;;  %v1830_v36 = vshrl.u32 %v5768_v23, 16  ;;  %v1833_v37 = vshll.u32 %v5768_v23, 16 }
  0x24   : > { %v468_v38 = vshrl.u32 %v5749_v0, 16  ;;  %v1819_v40 = vsel %vm1775_vm3, %v1809_v12, %v1818_v29  ;;  %v459_v41 = vsel %vm415_vm1, %v454_v25, %v458_v30  ;;  %v462_v42 = vor.u32 %v460_v27, %v458_v30  ;;  %v5821_v25 = vld [vmem:[%s5669_s30 + $0x50] sm:$0xff]  }
  0x25   : > { %4697 = vmatmul.mubr.msk.bf16.gmra.mrb[4].mxu1 %vm564_vm2, %v451_v16  ;;  %v466_v43 = vrot.slane %v464_v32, 1  ;;  %v1827_v45 = vor.u32 %v1826_v6, %v1823_v31  ;;  %v1832_v46 = vrot.slane %v1830_v36, 1  ;;  %v1835_v47 = vrot.slane %v1833_v37, 2 }
  0x26   : > { %4700 = vmatprep.mubr.msk.bf16.mxu1 %vm564_vm2, %v459_v41  ;;  %v472_v50 = vshll.u32 %v5777_v35, 16  ;;  %v1839_v55 = vshrl.u32 %v5788_v44, 16  ;;  %v1842_v56 = vshll.u32 %v5788_v44, 16  ;;  %v476_v61 = vshrl.u32 %v5777_v35, 16  ;;  %v5831_v41 = vld [vmem:[%s5669_s30 + $0x58] sm:$0xff]  }
  0x27   : > { %v467_v52 = vsel %vm415_vm1, %v462_v42, %v466_v43  ;;  %v470_v53 = vor.u32 %v468_v38, %v466_v43  ;;  %v1828_v57 = vsel %vm1775_vm3, %v1818_v29, %v1827_v45  ;;  %v1836_v58 = vor.u32 %v1835_v47, %v1832_v46  ;;  %v5826_v29 = vld [vmem:[%s5669_s30 + $0x58] sm:$0xff]  }
  0x28   : > { %v474_v60 = vrot.slane %v472_v50, 1  ;;  %4849 = vmatmul.mubr.msk.bf16.gmra.mrb[4].mxu0 %vm564_vm2, %v1819_v40  ;;  %v1841_v3 = vrot.slane %v1839_v55, 1  ;;  %v1844_v4 = vrot.slane %v1842_v56, 2  ;;  %v480_v5 = vshll.u32 %v5793_v51, 16 }
  0x29   : > { %v484_v7 = vshrl.u32 %v5793_v51, 16  ;;  %4852 = vmatprep.mubr.msk.bf16.mxu0 %vm564_vm2, %v1828_v57  ;;  %v1848_v12 = vshrl.u32 %v5801_v62, 16  ;;  %v1851_v16 = vshll.u32 %v5801_v62, 16  ;;  %v488_v17 = vshll.u32 %v5804_v63, 16  ;;  %v2216_v57 = vld [vmem:[%s5669_s30 + $0x8] sm:$0xc] }
  0x2a   : > { %v475_v11 = vsel %vm415_vm1, %v470_v53, %v474_v60  ;;  %v1845_v15 = vor.u32 %v1844_v4, %v1841_v3  ;;  %v482_v21 = vrot.slane %v480_v5, 1  ;;  %v1857_v22 = vshrl.u32 %v5813_v14, 16 }
  0x2b   : > { %v1860_v24 = vshll.u32 %v5813_v14, 16  ;;  %v1837_v26 = vsel %vm1775_vm3, %v1827_v45, %v1836_v58  ;;  %v478_v27 = vor.u32 %v476_v61, %v474_v60  ;;  %v1850_v30 = vrot.slane %v1848_v12, 1 }
  0x2c   : > { %v1853_v31 = vrot.slane %v1851_v16, 2  ;;  %v486_v32 = vor.u32 %v484_v7, %v482_v21  ;;  %v490_v6 = vrot.slane %v488_v17, 1  ;;  %v1846_v36 = vsel %vm1775_vm3, %v1836_v58, %v1845_v15  ;;  %v5845_v58 = vld [vmem:[%s5669_s30 + $0x60] sm:$0xff]  }
  0x2d   : > { %4701 = vmatmul.mubr.msk.bf16.gmra.mrb[8].mxu1 %vm564_vm2, %v467_v52  ;;  %v1859_v37 = vrot.slane %v1857_v22, 1  ;;  %v1862_v38 = vrot.slane %v1860_v24, 2  ;;  %v496_v40 = vshll.u32 %v5821_v25, 16  ;;  %v483_v42 = vsel %vm415_vm1, %v478_v27, %v482_v21 }
  0x2e   : > { %4704 = vmatprep.mubr.msk.bf16.mxu1 %vm564_vm2, %v475_v11  ;;  %v492_v43 = vshrl.u32 %v5804_v63, 16  ;;  %v1866_v45 = vshrl.u32 %v5826_v29, 16  ;;  %v1869_v46 = vshll.u32 %v5826_v29, 16  ;;  %v1854_v47 = vor.u32 %v1853_v31, %v1850_v30  ;;  %v5850_v11 = vld [vmem:[%s5669_s30 + $0x68] sm:$0xff]  }
  0x2f   : > { %v491_v50 = vsel %vm415_vm1, %v486_v32, %v490_v6  ;;  %v500_v52 = vshrl.u32 %v5821_v25, 16  ;;  %v504_v53 = vshll.u32 %v5831_v41, 16  ;;  %v1863_v55 = vor.u32 %v1862_v38, %v1859_v37  ;;  %v5867_v32 = vld [vmem:[%s5669_s30 + $0x70] sm:$0xff]  }
  0x30   : > { %4853 = vmatmul.mubr.msk.bf16.gmra.mrb[8].mxu0 %vm564_vm2, %v1837_v26  ;;  %v498_v56 = vrot.slane %v496_v40, 1  ;;  %v494_v60 = vor.u32 %v492_v43, %v490_v6  ;;  %v1868_v61 = vrot.slane %v1866_v45, 1  ;;  %v1871_v3 = vrot.slane %v1869_v46, 2  ;;  %v5873_v40 = vld [vmem:[%s5669_s30 + $0x78] sm:$0xff]  }
  0x31   : > { %4856 = vmatprep.mubr.msk.bf16.mxu0 %vm564_vm2, %v1846_v36  ;;  %v1855_v4 = vsel %vm1775_vm3, %v1845_v15, %v1854_v47  ;;  %v506_v7 = vrot.slane %v504_v53, 1  ;;  %v1864_v12 = vsel %vm1775_vm3, %v1854_v47, %v1863_v55  ;;  %v4382_v16 = vcombine.low %v2216_v57, %v5687_v13 }
  0x32   : > { %v502_v5 = vor.u32 %v500_v52, %v498_v56  ;;  %v512_v17 = vshll.u32 %v5845_v58, 16  ;;  %v499_v21 = vsel %vm415_vm1, %v494_v60, %v498_v56  ;;  %v508_v22 = vshrl.u32 %v5831_v41, 16  ;;  %v5888_v56 = vld [vmem:[%s5669_s30 + $0x80] sm:$0xff]  }
  0x33   : > { %v5859_v15 = vor.u32 %v1871_v3, %v1868_v61  ;;  %v516_v26 = vshrl.u32 %v5845_v58, 16  ;;  %v520_v27 = vshll.u32 %v5850_v11, 16  ;;  %v2223_v13 = vrot.slane %v4382_v16, 2 }
  0x34   : > { %v507_v24 = vsel %vm415_vm1, %v502_v5, %v506_v7  ;;  %v2224_v30 = vrot.slane %v5694_v18, 2  ;;  %v514_v31 = vrot.slane %v512_v17, 1  ;;  %v510_v6 = vor.u32 %v508_v22, %v506_v7 }
  0x35   : > { %4705 = vmatmul.mubr.msk.bf16.gmra.mrb[12].mxu1 %vm564_vm2, %v483_v42  ;;  %v1873_v36 = vsel %vm1775_vm3, %v1863_v55, %v5859_v15  ;;  %v522_v38 = vrot.slane %v520_v27, 1  ;;  %v528_v18 = vshll.u32 %v5867_v32, 16  ;;  %v2226_v45 = vrot.slane %v5708_v28, 2  ;;  %v5918_v27 = vld [vmem:[%s5669_s30 + $0x90] ss:$0 sps:$4 sm:$0x11]  }
  0x36   : > { %4708 = vmatprep.mubr.msk.bf16.mxu1 %vm564_vm2, %v491_v50  ;;  %v518_v37 = vor.u32 %v516_v26, %v514_v31  ;;  %v2225_v42 = vsel %vm2222_vm4, %v2223_v13, %v2224_v30  ;;  %v515_v43 = vsel %vm415_vm1, %v510_v6, %v514_v31  ;;  %v524_v46 = vshrl.u32 %v5850_v11, 16 }
  0x37   : > { %v532_v50 = vshrl.u32 %v5867_v32, 16  ;;  %v536_v52 = vshll.u32 %v5873_v40, 16  ;;  %v2228_v53 = vrot.slane %v5714_v34, 2  ;;  %v530_v55 = vrot.slane %v528_v18, 1  ;;  %v5901_v34 = vld [vmem:[%s6804_s1 + $0x1c] sm:$0xf] }
  0x38   : > { %4857 = vmatmul.mubr.msk.bf16.gmra.mrb[12].mxu0 %vm564_vm2, %v1855_v4  ;;  %v523_v47 = vsel %vm415_vm1, %v518_v37, %v522_v38  ;;  %v2754_v28 = vsel %vm619_vm0, %v5754_v1, 0  ;;  %v526_v57 = vor.u32 %v524_v46, %v522_v38  ;;  %v2227_v60 = vsel %vm2222_vm4, %v2224_v30, %v2226_v45  ;;  %v5895_v4 = vld [vmem:[%s5669_s30 + $0x88] sm:$0xff]  }
  0x39   : > { %4860 = vmatprep.mubr.msk.bf16.mxu0 %vm564_vm2, %v1864_v12  ;;  %v534_v61 = vor.u32 %v532_v50, %v530_v55  ;;  %v538_v3 = vrot.slane %v536_v52, 1  ;;  %v2229_v5 = vsel %vm2222_vm4, %v2226_v45, %v2228_v53  ;;  %v544_v7 = vshll.u32 %v5888_v56, 16 }
  0x3a   : > { %v531_v1 = vsel %vm415_vm1, %v526_v57, %v530_v55  ;;  %v2230_v12 = vrot.slane %v5732_v49, 2  ;;  %v540_v16 = vshrl.u32 %v5873_v40, 16  ;;  %v552_v22 = vshll.u32 %v5895_v4, 16  ;;  %v5945_v55 = vld [vmem:[%s5669_s30 + $0x60] sm:$0xff]   ;;  %v5964_v57 = vld [vmem:[%s5669_s30 + $0x68] sm:$0xff]  }
  0x3b   : > { %v539_v17 = vsel %vm415_vm1, %v534_v61, %v538_v3  ;;  %v546_v26 = vrot.slane %v544_v7, 1  ;;  %v560_v37 = vshll.u32 %v5918_v27, 16  ;;  %v2234_v38 = vrot.slane %v5768_v23, 2  ;;  %v5982_v7 = vld [vmem:[%s5669_s30 + $0x78] sm:$0xff]  }
  0x3c   : > { %v542_v49 = vor.u32 %v540_v16, %v538_v3  ;;  %v2231_v13 = vsel %vm2222_vm4, %v2228_v53, %v2230_v12  ;;  %v554_v31 = vrot.slane %v552_v22, 1  ;;  %v2236_v18 = vrot.slane %v5788_v44, 2  ;;  %v5998_v22 = vld [vmem:[%s5669_s30 + $0x88] sm:$0xff]  }
  0x3d   : > { %4709 = vmatmul.mubr.msk.bf16.gmra.mrb[16].mxu1 %vm564_vm2, %v499_v21  ;;  %v548_v21 = vshrl.u32 %v5888_v56, 16  ;;  %v562_v45 = vrot.slane %v560_v37, 1  ;;  %v2238_v23 = vrot.slane %v5801_v62, 2  ;;  %v2240_v44 = vrot.slane %v5813_v14, 2 }
  0x3e   : > { %4712 = vmatprep.mubr.msk.bf16.mxu1 %vm564_vm2, %v507_v24  ;;  %v2232_v24 = vrot.slane %v5744_v59, 2  ;;  %v547_v59 = vsel %vm415_vm1, %v542_v49, %v546_v26  ;;  %v2242_v62 = vrot.slane %v5826_v29, 2  ;;  %v1115_v14 = vsel %vm619_vm0, %v5720_v39, 0 }
  0x3f   : > { %v550_v30 = vor.u32 %v548_v21, %v546_v26  ;;  %v2239_v52 = vsel %vm2222_vm4, %v2236_v18, %v2238_v23  ;;  %v2241_v53 = vsel %vm2222_vm4, %v2238_v23, %v2240_v44  ;;  %v2246_v61 = vrot.slane %v5964_v57, 2  ;;  %v6002_v26 = vld [vmem:[%s5669_s30 + $0x90] sm:$0xff]  }
  0x40   : > { %4861 = vmatmul.mubr.msk.bf16.gmra.mrb[16].mxu0 %vm564_vm2, %v1873_v36  ;;  %v2233_v6 = vsel %vm2222_vm4, %v2230_v12, %v2232_v24  ;;  %v556_v36 = vshrl.u32 %v5895_v4, 16  ;;  %v2235_v46 = vsel %vm2222_vm4, %v2232_v24, %v2234_v38  ;;  %v2243_v29 = vsel %vm2222_vm4, %v2240_v44, %v2242_v62  ;;  %v5986_v12 = vld [vmem:[%s5669_s30 + $0x80] sm:$0xff]  }
  0x41   : > { %4882 = vmatprep.mubr.msk.bf16.mxu0 %vm564_vm2, %v2225_v42  ;;  %v555_v42 = vsel %vm415_vm1, %v550_v30, %v554_v31  ;;  %v2250_v16 = vrot.slane %v5982_v7, 2  ;;  %v2254_v49 = vrot.slane %v5998_v22, 2  ;;  %v2530_v30 = vld [vmem:[%s5669_s30 + $0x10] sm:$0xc] }
  0x45   : > { %4713 = vmatmul.mubr.msk.bf16.gmra.mrb[20].mxu1 %vm564_vm2, %v515_v43  ;;  %v558_v43 = vor.u32 %v556_v36, %v554_v31  ;;  %v6012_v31 = vld [vmem:[%s5669_s30 + $0x14] sm:$0xf] }
  0x46   : > { %4716 = vmatprep.mubr.msk.bf16.mxu1 %vm564_vm2, %v523_v47  ;;  %v2237_v47 = vsel %vm2222_vm4, %v2234_v38, %v2236_v18  ;;  %v6022_v37 = vcombine.low %v2530_v30, %v6012_v31  ;;  %v6025_v38 = vld [vmem:[%s5669_s30 + $0x18] sm:$0xff]  }
  0x47   : > { %v563_v50 = vsel %vm415_vm1, %v558_v43, %v562_v45  ;;  %v2663_v43 = vrot.slane %v6025_v38, 2 }
  0x48   : > { %4883 = vmatmul.mubr.msk.bf16.vlgmr.msra.gmra.mrb[0].mxu0 %vm564_vm2, %v2227_v60  ;;  %v5970_v60 = vld [vmem:[%s5669_s30 + $0x70] sm:$0xff]   ;;  %v2662_v18 = vrot.slane %v6022_v37, 2 }
  0x49   : > { %4919 = vmatpush3.bf16.msra.mxu0 %v2754_v28  ;;  %4886 = vmatprep.mubr.msk.bf16.mxu0 %vm564_vm2, %v2229_v5  ;;  %v2244_v28 = vrot.slane %v5945_v55, 2  ;;  %v2248_v3 = vrot.slane %v5970_v60, 2 }
  0x4a   : > { %5330 = vmatprep.subr.msk.bf16.mxu0 %vm619_vm0, %v5901_v34 }
  0x4b   : > { %v2245_v39 = vsel %vm2222_vm4, %v2242_v62, %v2244_v28  ;;  %v2247_v5 = vsel %vm2222_vm4, %v2244_v28, %v2246_v61  ;;  %v2251_v21 = vsel %vm2222_vm4, %v2248_v3, %v2250_v16  ;;  %v3201_v62 = vsel %vm619_vm0, %v5901_v34, 0  ;;  %v6060_v28 = vld [vmem:[%s5669_s30 + $0x38] sm:$0xff]  }
  0x4d   : > { %4717 = vmatmul.mubr.msk.bf16.gmra.mrb[24].mxu1 %vm564_vm2, %v531_v1  ;;  %v2249_v1 = vsel %vm2222_vm4, %v2246_v61, %v2248_v3  ;;  %v2671_v61 = vrot.slane %v6060_v28, 2  ;;  %v6079_v3 = vld [vmem:[%s5669_s30 + $0x40] sm:$0xff]  }
  0x4e   : > { %4720 = vmatprep.mubr.msk.bf16.mxu1 %vm564_vm2, %v539_v17  ;;  %v2252_v17 = vrot.slane %v5986_v12, 2 }
  0x50   : > { %4887 = vmatmul.mubr.msk.bf16.gmra.mrb[4].mxu0 %vm564_vm2, %v2231_v13  ;;  %v2253_v24 = vsel %vm2222_vm4, %v2250_v16, %v2252_v17  ;;  %v2256_v13 = vrot.slane %v6002_v26, 2  ;;  %v1016_v16 = vld [vmem:[%s5669_s30] sm:$0xe] }
  0x51   : > { %4890 = vmatprep.mubr.msk.bf16.mxu0 %vm564_vm2, %v2233_v6  ;;  %v2255_v6 = vsel %vm2222_vm4, %v2252_v17, %v2254_v49  ;;  %v2673_v17 = vrot.slane %v6079_v3, 2 }
  0x52   : > { %v2257_v36 = vsel %vm2222_vm4, %v2254_v49, %v2256_v13 }
  0x53   : > { %v2674_v49 = vsel %vm2222_vm4, %v2671_v61, %v2673_v17 }
  0x55   : > { %4721 = vmatmul.mubr.msk.bf16.gmra.mrb[28].mxu1 %vm564_vm2, %v547_v59  ;;  %v6018_v59 = vld [vmem:[%s5669_s30 + $0x98] ss:$0 sps:$4 sm:$0x33]  }
  0x56   : > { %4724 = vmatprep.mubr.msk.bf16.mxu1 %vm564_vm2, %v555_v42  ;;  %v2258_v42 = vrot.slane %v6018_v59, 2 }
  0x58   : > { %4891 = vmatmul.mubr.msk.bf16.gmra.mrb[8].mxu0 %vm564_vm2, %v2235_v46  ;;  %v2259_v45 = vsel %vm2222_vm4, %v2256_v13, %v2258_v42  ;;  %v6038_v46 = vld [vmem:[%s5669_s30 + $0x20] sm:$0xff]   ;;  %v6097_v13 = vld [vmem:[%s5669_s30 + $0x50] sm:$0xff]  }
  0x59   : > { %4894 = vmatprep.mubr.msk.bf16.mxu0 %vm564_vm2, %v2237_v47  ;;  %v2664_v47 = vsel %vm2222_vm4, %v2662_v18, %v2663_v43  ;;  %v2665_v23 = vrot.slane %v6038_v46, 2  ;;  %v2677_v42 = vrot.slane %v6097_v13, 2 }
  0x5d   : > { %4725 = vmatmul.mubr.msk.bf16.gmra.mrb[32].mxu1 %vm564_vm2, %v563_v50  ;;  %v6042_v50 = vld [vmem:[%s5669_s30 + $0x28] sm:$0xff]  }
  0x5e   : > { %4730 = vmatprep.mubr.msk.bf16.mxu1 %vm564_vm2, %v5679_v9  ;;  %v5956_v9 = vld [vmem:[%s6804_s1 + $0xc] sm:$0xf]  ;;  %v2667_v44 = vrot.slane %v6042_v50, 2 }
  0x60   : > { %4895 = vmatmul.mubr.msk.bf16.gmra.mrb[12].mxu0 %vm564_vm2, %v2239_v52  ;;  %v2666_v52 = vsel %vm2222_vm4, %v2663_v43, %v2665_v23 }
  0x61   : > { %4898 = vmatprep.mubr.msk.bf16.mxu0 %vm564_vm2, %v2241_v53  ;;  %v6054_v53 = vld [vmem:[%s5669_s30 + $0x30] sm:$0xff]  }
  0x65   : > { %4731 = vmatmul.mubr.msk.bf16.vlgmr.msra.gmra.mrb[0].mxu1 %vm564_vm2, %v5682_v10 }
  0x66   : > { %4734 = vmatprep.mubr.msk.bf16.mxu1 %vm564_vm2, %v5697_v19  ;;  %4767 = vmatpush3.bf16.msra.mxu1 %v1115_v14  ;;  %v2668_v14 = vsel %vm2222_vm4, %v2665_v23, %v2667_v44  ;;  %v1028_v23 = vrot.slane %v5711_v33, 1 }
  0x67   : > { %5325 = vmatprep.subr.msk.bf16.mxu1 %vm619_vm0, %v5956_v9 }
  0x68   : > { %4899 = vmatmul.mubr.msk.bf16.gmra.mrb[16].mxu0 %vm564_vm2, %v2243_v29  ;;  %v6065_v29 = vld [vmem:[%s6804_s1 + $0x20] sm:$0xf] }
  0x69   : > { %4902 = vmatprep.mubr.msk.bf16.mxu0 %vm564_vm2, %v2245_v39  ;;  %v2669_v39 = vrot.slane %v6054_v53, 2 }
  0x6b   : > { %v2670_v34 = vsel %vm2222_vm4, %v2667_v44, %v2669_v39 }
  0x6d   : > { %4735 = vmatmul.mubr.msk.bf16.gmra.mrb[4].mxu1 %vm564_vm2, %v5711_v33 }
  0x6e   : > { %4738 = vmatprep.mubr.msk.bf16.mxu1 %vm564_vm2, %v5729_v48 }
  0x70   : > { %4903 = vmatmul.mubr.msk.bf16.gmra.mrb[20].mxu0 %vm564_vm2, %v2247_v5  ;;  %v2672_v5 = vsel %vm2222_vm4, %v2669_v39, %v2671_v61  ;;  %v1554_v39 = vsel %vm619_vm0, %v5956_v9, 0  ;;  %v1030_v61 = vrot.slane %v5729_v48, 1  ;;  %v5564_v9 = vld [vmem:[%s6804_s1 + $0x10] sm:$0xf] }
  0x71   : > { %4906 = vmatprep.mubr.msk.bf16.mxu0 %vm564_vm2, %v2249_v1  ;;  %v6083_v1 = vld [vmem:[%s5669_s30 + $0x48] sm:$0xff]  }
  0x72   : > { %v1031_v48 = vsel %vm1022_vm5, %v1028_v23, %v1030_v61 }
  0x75   : > { %4739 = vmatmul.mubr.msk.bf16.gmra.mrb[8].mxu1 %vm564_vm2, %v5738_v54 }
  0x76   : > { %4742 = vmatprep.mubr.msk.bf16.mxu1 %vm564_vm2, %v5749_v0 }
  0x78   : > { %4907 = vmatmul.mubr.msk.bf16.gmra.mrb[24].mxu0 %vm564_vm2, %v2251_v21  ;;  %v4304_v21 = vcombine.low %v1016_v16, %v5676_v8  ;;  %v6102_v8 = vld [vmem:[%s5669_s30 + $0x58] sm:$0xff]   ;;  %v1032_v16 = vrot.slane %v5738_v54, 1 }
  0x79   : > { %4910 = vmatprep.mubr.msk.bf16.mxu0 %vm564_vm2, %v2253_v24  ;;  %v2675_v24 = vrot.slane %v6083_v1, 2  ;;  %v2679_v43 = vrot.slane %v6102_v8, 2 }
  0x7a   : > { %v1023_v30 = vrot.slane %v4304_v21, 1  ;;  %v6144_v21 = vld [vmem:[%s5669_s30 + $0x78] sm:$0xff]   ;;  %v1033_v54 = vsel %vm1022_vm5, %v1030_v61, %v1032_v16 }
  0x7b   : > { %v2680_v44 = vsel %vm2222_vm4, %v2677_v42, %v2679_v43 }
  0x7d   : > { %4743 = vmatmul.mubr.msk.bf16.gmra.mrb[12].mxu1 %vm564_vm2, %v5777_v35 }
  0x7e   : > { %4746 = vmatprep.mubr.msk.bf16.mxu1 %vm564_vm2, %v5793_v51 }
  0x80   : > { %4911 = vmatmul.mubr.msk.bf16.gmra.mrb[28].mxu0 %vm564_vm2, %v2255_v6  ;;  %v1024_v6 = vrot.slane %v5682_v10, 1  ;;  %v1026_v10 = vrot.slane %v5697_v19, 1 }
  0x81   : > { %4914 = vmatprep.mubr.msk.bf16.mxu0 %vm564_vm2, %v2257_v36  ;;  %v2676_v36 = vsel %vm2222_vm4, %v2673_v17, %v2675_v24 }
  0x82   : > { %v1025_v18 = vsel %vm1022_vm5, %v1023_v30, %v1024_v6  ;;  %v1034_v30 = vrot.slane %v5749_v0, 1 }
  0x85   : > { %4747 = vmatmul.mubr.msk.bf16.gmra.mrb[16].mxu1 %vm564_vm2, %v5804_v63 }
  0x86   : > { %4750 = vmatprep.mubr.msk.bf16.mxu1 %vm564_vm2, %v5821_v25 }
  0x88   : > { %4915 = vmatmul.mubr.msk.bf16.gmra.mrb[32].mxu0 %vm564_vm2, %v2259_v45  ;;  %v2678_v45 = vsel %vm2222_vm4, %v2675_v24, %v2677_v42  ;;  %v1036_v42 = vrot.slane %v5777_v35, 1  ;;  %v1038_v35 = vrot.slane %v5793_v51, 1 }
  0x89   : > { %4920 = vmatprep.mubr.msk.bf16.mxu0 %vm564_vm2, %v2664_v47  ;;  %v6115_v47 = vld [vmem:[%s5669_s30 + $0x60] sm:$0xff]  }
  0x8a   : > { %v2681_v19 = vrot.slane %v6115_v47, 2 }
  0x8d   : > { %4751 = vmatmul.mubr.msk.bf16.gmra.mrb[20].mxu1 %vm564_vm2, %v5831_v41 }
  0x8e   : > { %4754 = vmatprep.mubr.msk.bf16.mxu1 %vm564_vm2, %v5845_v58 }
  0x90   : > { %4921 = vmatmul.mubr.msk.bf16.vlgmr.msra.gmra.mrb[0].mxu0 %vm564_vm2, %v2666_v52  ;;  %v6120_v52 = vld [vmem:[%s5669_s30 + $0x68] sm:$0xff]  }
  0x91   : > { %4957 = vmatpush3.bf16.msra.mxu0 %v3201_v62  ;;  %4924 = vmatprep.mubr.msk.bf16.mxu0 %vm564_vm2, %v2668_v14  ;;  %v1027_v62 = vsel %vm1022_vm5, %v1024_v6, %v1026_v10  ;;  %v1029_v14 = vsel %vm1022_vm5, %v1026_v10, %v1028_v23  ;;  %v2683_v33 = vrot.slane %v6120_v52, 2  ;;  %v1035_v10 = vsel %vm1022_vm5, %v1032_v16, %v1034_v30 }
  0x92   : > { %5331 = vmatprep.subr.msk.bf16.mxu0 %vm619_vm0, %v6065_v29  ;;  %v2977_v16 = vshrl.u32 %v6022_v37, 16 }
  0x93   : > { %v2684_v17 = vsel %vm2222_vm4, %v2681_v19, %v2683_v33 }
  0x95   : > { %4755 = vmatmul.mubr.msk.bf16.gmra.mrb[24].mxu1 %vm564_vm2, %v5850_v11 }
  0x96   : > { %4758 = vmatprep.mubr.msk.bf16.mxu1 %vm564_vm2, %v5867_v32 }
  0x98   : > { %4925 = vmatmul.mubr.msk.bf16.gmra.mrb[4].mxu0 %vm564_vm2, %v2670_v34  ;;  %v2682_v34 = vsel %vm2222_vm4, %v2679_v43, %v2681_v19  ;;  %v6162_v43 = vld [vmem:[%s5669_s30 + $0x88] sm:$0xff]   ;;  %v1040_v19 = vrot.slane %v5804_v63, 1  ;;  %v2980_v63 = vshll.u32 %v6022_v37, 16 }
  0x99   : > { %4928 = vmatprep.mubr.msk.bf16.mxu0 %vm564_vm2, %v2672_v5  ;;  %v6135_v5 = vld [vmem:[%s5669_s30 + $0x70] sm:$0xff]   ;;  %v2691_v23 = vrot.slane %v6162_v43, 2 }
  0x9a   : > { %v2685_v24 = vrot.slane %v6135_v5, 2  ;;  %v1041_v51 = vsel %vm1022_vm5, %v1038_v35, %v1040_v19 }
  0x9c   : > { %v2686_v6 = vsel %vm2222_vm4, %v2683_v33, %v2685_v24  ;;  %v1039_v33 = vsel %vm1022_vm5, %v1036_v42, %v1038_v35 }
  0x9d   : > { %4759 = vmatmul.mubr.msk.bf16.gmra.mrb[28].mxu1 %vm564_vm2, %v5873_v40 }
  0x9e   : > { %4762 = vmatprep.mubr.msk.bf16.mxu1 %vm564_vm2, %v5888_v56 }
  0xa0   : > { %4929 = vmatmul.mubr.msk.bf16.gmra.mrb[8].mxu0 %vm564_vm2, %v2674_v49  ;;  %v2687_v49 = vrot.slane %v6144_v21, 2 }
  0xa1   : > { %4932 = vmatprep.mubr.msk.bf16.mxu0 %vm564_vm2, %v2676_v36  ;;  %v6157_v36 = vld [vmem:[%s5669_s30 + $0x80] sm:$0xff]  }
  0xa2   : > { %v2689_v0 = vrot.slane %v6157_v36, 2 }
  0xa5   : > { %4763 = vmatmul.mubr.msk.bf16.gmra.mrb[32].mxu1 %vm564_vm2, %v5895_v4 }
  0xa6   : > { %4768 = vmatprep.mubr.msk.bf16.mxu1 %vm564_vm2, %v1025_v18  ;;  %v2688_v18 = vsel %vm2222_vm4, %v2685_v24, %v2687_v49 }
  0xa8   : > { %4933 = vmatmul.mubr.msk.bf16.gmra.mrb[12].mxu0 %vm564_vm2, %v2678_v45  ;;  %v1037_v45 = vsel %vm1022_vm5, %v1034_v30, %v1036_v42  ;;  %v1044_v30 = vrot.slane %v5831_v41, 1  ;;  %v2982_v42 = vrot.slane %v2980_v63, 3  ;;  %v3003_v41 = vshrl.u32 %v6042_v50, 16 }
  0xa9   : > { %4936 = vmatprep.mubr.msk.bf16.mxu0 %vm564_vm2, %v2680_v44  ;;  %v2690_v44 = vsel %vm2222_vm4, %v2687_v49, %v2689_v0  ;;  %v5416_v49 = vld [vmem:[%s5669_s30 + $0xa0] ss:$0 sps:$4 sm:$0x33]  }
  0xad   : > { %4769 = vmatmul.mubr.msk.bf16.vlgmr.msra.gmra.mrb[0].mxu1 %vm564_vm2, %v1027_v62  ;;  %v6175_v62 = vld [vmem:[%s5669_s30 + $0x90] sm:$0xff]  }
  0xae   : > { %4772 = vmatprep.mubr.msk.bf16.mxu1 %vm564_vm2, %v1029_v14  ;;  %4805 = vmatpush3.bf16.msra.mxu1 %v1554_v39  ;;  %v6179_v14 = vld [vmem:[%s5669_s30 + $0x98] sm:$0xff]   ;;  %v2692_v39 = vsel %vm2222_vm4, %v2689_v0, %v2691_v23  ;;  %v2693_v61 = vrot.slane %v6175_v62, 2  ;;  %v2697_v0 = vrot.slane %v5416_v49, 2 }
  0xaf   : > { %5327 = vmatprep.subr.msk.bf16.mxu1 %vm619_vm0, %v5564_v9  ;;  %v2985_v9 = vshrl.u32 %v6025_v38, 16 }
  0xb0   : > { %4937 = vmatmul.mubr.msk.bf16.gmra.mrb[16].mxu0 %vm564_vm2, %v2682_v34  ;;  %v2695_v34 = vrot.slane %v6179_v14, 2  ;;  %v2694_v24 = vsel %vm2222_vm4, %v2691_v23, %v2693_v61  ;;  %v2997_v23 = vshll.u32 %v6038_v46, 16 }
  0xb1   : > { %4940 = vmatprep.mubr.msk.bf16.mxu0 %vm564_vm2, %v2684_v17  ;;  %v2988_v17 = vshll.u32 %v6025_v38, 16  ;;  %v2987_v37 = vrot.slane %v2985_v9, 2  ;;  %v3005_v9 = vrot.slane %v3003_v41, 2  ;;  %v3030_v41 = vshrl.u32 %v6079_v3, 16 }
  0xb5   : > { %4773 = vmatmul.mubr.msk.bf16.gmra.mrb[4].mxu1 %vm564_vm2, %v1031_v48  ;;  %v1042_v48 = vrot.slane %v5821_v25, 1 }
  0xb6   : > { %4776 = vmatprep.mubr.msk.bf16.mxu1 %vm564_vm2, %v1033_v54  ;;  %v2696_v54 = vsel %vm2222_vm4, %v2693_v61, %v2695_v34 }
  0xb7   : > { %v1045_v25 = vsel %vm1022_vm5, %v1042_v48, %v1044_v30 }
  0xb8   : > { %4941 = vmatmul.mubr.msk.bf16.gmra.mrb[20].mxu0 %vm564_vm2, %v2686_v6  ;;  %v2979_v6 = vrot.slane %v2977_v16, 2  ;;  %v1048_v16 = vrot.slane %v5850_v11, 1  ;;  %v3021_v11 = vshrl.u32 %v6060_v28, 16 }
  0xb9   : > { %4944 = vmatprep.mubr.msk.bf16.mxu0 %vm564_vm2, %v2688_v18  ;;  %v2990_v18 = vrot.slane %v2988_v17, 3 }
  0xba   : > { %v2983_v35 = vor.u32 %v2982_v42, %v2979_v6  ;;  %v3024_v6 = vshll.u32 %v6060_v28, 16 }
  0xbd   : > { %4777 = vmatmul.mubr.msk.bf16.gmra.mrb[8].mxu1 %vm564_vm2, %v1035_v10  ;;  %v1043_v10 = vsel %vm1022_vm5, %v1040_v19, %v1042_v48  ;;  %v1046_v19 = vrot.slane %v5845_v58, 1  ;;  %v3012_v58 = vshrl.u32 %v6054_v53, 16 }
  0xbe   : > { %4780 = vmatprep.mubr.msk.bf16.mxu1 %vm564_vm2, %v1037_v45  ;;  %v2994_v45 = vshrl.u32 %v6038_v46, 16 }
  0xbf   : > { %v1047_v48 = vsel %vm1022_vm5, %v1044_v30, %v1046_v19  ;;  %v1050_v30 = vrot.slane %v5867_v32, 1  ;;  %v3033_v32 = vshll.u32 %v6079_v3, 16 }
  0xc0   : > { %4945 = vmatmul.mubr.msk.bf16.gmra.mrb[24].mxu0 %vm564_vm2, %v2690_v44  ;;  %v2991_v44 = vor.u32 %v2990_v18, %v2987_v37  ;;  %v2996_v61 = vrot.slane %v2994_v45, 2  ;;  %v3014_v37 = vrot.slane %v3012_v58, 2  ;;  %v3023_v45 = vrot.slane %v3021_v11, 2 }
  0xc1   : > { %4948 = vmatprep.mubr.msk.bf16.mxu0 %vm564_vm2, %v2692_v39  ;;  %v3006_v39 = vshll.u32 %v6042_v50, 16  ;;  %v3048_v58 = vshrl.u32 %v6097_v13, 16  ;;  %v3060_v11 = vshll.u32 %v6102_v8, 16 }
  0xc2   : > { %v2992_v63 = vsel %vm2975_vm6, %v2983_v35, %v2991_v44  ;;  %v1051_v35 = vsel %vm1022_vm5, %v1048_v16, %v1050_v30 }
  0xc3   : > { %v3008_v17 = vrot.slane %v3006_v39, 3 }
  0xc5   : > { %4781 = vmatmul.mubr.msk.bf16.gmra.mrb[12].mxu1 %vm564_vm2, %v1039_v33  ;;  %v2698_v33 = vsel %vm2222_vm4, %v2695_v34, %v2697_v0  ;;  %v3015_v34 = vshll.u32 %v6054_v53, 16  ;;  %v3009_v49 = vor.u32 %v3008_v17, %v3005_v9  ;;  %v3515_v0 = vsel %vm619_vm0, %v6065_v29, 0 }
  0xc6   : > { %4784 = vmatprep.mubr.msk.bf16.mxu1 %vm564_vm2, %v1041_v51  ;;  %v2999_v51 = vrot.slane %v2997_v23, 3  ;;  %v3026_v23 = vrot.slane %v3024_v6, 3  ;;  %v3039_v29 = vshrl.u32 %v6083_v1, 16 }
  0xc7   : > { %v3017_v18 = vrot.slane %v3015_v34, 3  ;;  %v3051_v34 = vshll.u32 %v6097_v13, 16 }
  0xc8   : > { %4949 = vmatmul.mubr.msk.bf16.gmra.mrb[28].mxu0 %vm564_vm2, %v2694_v24  ;;  %v3000_v24 = vor.u32 %v2999_v51, %v2996_v61  ;;  %v3027_v39 = vor.u32 %v3026_v23, %v3023_v45  ;;  %v3032_v61 = vrot.slane %v3030_v41, 2  ;;  %v3035_v51 = vrot.slane %v3033_v32, 3 }
  0xc9   : > { %4952 = vmatprep.mubr.msk.bf16.mxu0 %vm564_vm2, %v2696_v54  ;;  %v1049_v54 = vsel %vm1022_vm5, %v1046_v19, %v1048_v16  ;;  %v3042_v19 = vshll.u32 %v6083_v1, 16  ;;  %v3041_v17 = vrot.slane %v3039_v29, 2  ;;  %v3062_v23 = vrot.slane %v3060_v11, 3  ;;  %v5566_v29 = vld [vmem:[%s5669_s30 + $0x18] sm:$0xff]  }
  0xca   : > { %v3001_v42 = vsel %vm2975_vm6, %v2991_v44, %v3000_v24  ;;  %v3018_v44 = vor.u32 %v3017_v18, %v3014_v37  ;;  %v3053_v37 = vrot.slane %v3051_v34, 3  ;;  %v1462_v18 = vrot.slane %v5700_v20, 1 }
  0xcb   : > { %v3066_v32 = vshrl.u32 %v6115_v47, 16  ;;  %v3069_v20 = vshll.u32 %v6115_v47, 16  ;;  %v3087_v34 = vshll.u32 %v6135_v5, 16  ;;  %v3096_v11 = vshll.u32 %v6144_v21, 16 }
  0xcc   : > { %v3019_v16 = vsel %vm2975_vm6, %v3009_v49, %v3018_v44  ;;  %v3028_v9 = vsel %vm2975_vm6, %v3018_v44, %v3027_v39 }
  0xcd   : > { %4785 = vmatmul.mubr.msk.bf16.gmra.mrb[16].mxu1 %vm564_vm2, %v1043_v10  ;;  %v1052_v10 = vrot.slane %v5873_v40, 1 }
  0xce   : > { %4788 = vmatprep.mubr.msk.bf16.mxu1 %vm564_vm2, %v1045_v25  ;;  %v3010_v25 = vsel %vm2975_vm6, %v3000_v24, %v3009_v49 }
  0xcf   : > { %v1053_v40 = vsel %vm1022_vm5, %v1050_v30, %v1052_v10  ;;  %v1058_v30 = vrot.slane %v5918_v27, 1 }
  0xd0   : > { %4953 = vmatmul.mubr.msk.bf16.gmra.mrb[32].mxu0 %vm564_vm2, %v2698_v33  ;;  %v1054_v33 = vrot.slane %v5888_v56, 1 }
  0xd1   : > { %4958 = vmatprep.mubr.msk.bf16.mxu0 %vm564_vm2, %v2992_v63  ;;  %v1056_v63 = vrot.slane %v5895_v4, 1  ;;  %v3057_v4 = vshrl.u32 %v6102_v8, 16 }
  0xd2   : > { %v1055_v24 = vsel %vm1022_vm5, %v1052_v10, %v1054_v33  ;;  %v5565_v10 = vld [vmem:[%s5669_s30 + $0x10] sm:$0xff]  }
  0xd3   : > { %v1057_v56 = vsel %vm1022_vm5, %v1054_v33, %v1056_v63  ;;  %v3059_v45 = vrot.slane %v3057_v4, 2  ;;  %v3093_v4 = vshrl.u32 %v6144_v21, 16 }
  0xd5   : > { %4789 = vmatmul.mubr.msk.bf16.gmra.mrb[20].mxu1 %vm564_vm2, %v1047_v48  ;;  %v3044_v48 = vrot.slane %v3042_v19, 3  ;;  %v3063_v44 = vor.u32 %v3062_v23, %v3059_v45  ;;  %v1465_v19 = vrot.slane %v5566_v29, 1  ;;  %v3095_v45 = vrot.slane %v3093_v4, 2 }
  0xd6   : > { %4792 = vmatprep.mubr.msk.bf16.mxu1 %vm564_vm2, %v1049_v54  ;;  %v3036_v54 = vor.u32 %v3035_v51, %v3032_v61  ;;  %v3068_v61 = vrot.slane %v3066_v32, 2  ;;  %v3071_v51 = vrot.slane %v3069_v20, 3  ;;  %v3098_v23 = vrot.slane %v3096_v11, 3  ;;  %v5572_v11 = vld [vmem:[%s5669_s30 + $0x48] sm:$0xff]  }
  0xd7   : > { %v3045_v49 = vor.u32 %v3044_v48, %v3041_v17  ;;  %v3105_v32 = vshll.u32 %v6157_v36, 16  ;;  %v3132_v4 = vshll.u32 %v6179_v14, 16 }
  0xd8   : > { %4959 = vmatmul.mubr.msk.bf16.vlgmr.msra.gmra.mrb[0].mxu0 %vm564_vm2, %v3001_v42  ;;  %v3037_v6 = vsel %vm2975_vm6, %v3027_v39, %v3036_v54  ;;  %v3050_v42 = vrot.slane %v3048_v58, 2  ;;  %v3078_v39 = vshll.u32 %v6120_v52, 16  ;;  %v3084_v58 = vshrl.u32 %v6135_v5, 16 }
  0xd9   : > { %4995 = vmatpush3.bf16.msra.mxu0 %v3515_v0  ;;  %4962 = vmatprep.mubr.msk.bf16.mxu0 %vm564_vm2, %v3010_v25  ;;  %v1463_v0 = vrot.slane %v5565_v10, 1  ;;  %v3046_v25 = vsel %vm2975_vm6, %v3036_v54, %v3045_v49  ;;  %v3072_v54 = vor.u32 %v3071_v51, %v3068_v61  ;;  %v5569_v10 = vld [vmem:[%s5669_s30 + $0x30] sm:$0xff]   ;;  %v3099_v20 = vor.u32 %v3098_v23, %v3095_v45  ;;  %v5571_v51 = vld [vmem:[%s5669_s30 + $0x40] sm:$0xff]  }
  0xda   : > { %v3054_v41 = vor.u32 %v3053_v37, %v3050_v42  ;;  %v3080_v48 = vrot.slane %v3078_v39, 3  ;;  %v3086_v37 = vrot.slane %v3084_v58, 2  ;;  %v5570_v39 = vld [vmem:[%s5669_s30 + $0x38] sm:$0xff]   ;;  %v3107_v61 = vrot.slane %v3105_v32, 3 }
  0xdb   : > { %v1464_v27 = vsel %vm1022_vm5, %v1462_v18, %v1463_v0  ;;  %v3073_v42 = vsel %vm2975_vm6, %v3063_v44, %v3072_v54  ;;  %v3089_v18 = vrot.slane %v3087_v34, 3  ;;  %v1473_v29 = vrot.slane %v5570_v39, 1 }
  0xdc   : > { %v3055_v33 = vsel %vm2975_vm6, %v3045_v49, %v3054_v41  ;;  %v3123_v58 = vshll.u32 %v6175_v62, 16  ;;  %v3134_v23 = vrot.slane %v3132_v4, 3  ;;  %v3428_v4 = vrot.slane %v6042_v50, 3 }
  0xdd   : > { %4793 = vmatmul.mubr.msk.bf16.gmra.mrb[24].mxu1 %vm564_vm2, %v1051_v35  ;;  %v1059_v35 = vsel %vm1022_vm5, %v1056_v63, %v1058_v30  ;;  %v3430_v50 = vrot.slane %v6054_v53, 3 }
  0xde   : > { %4796 = vmatprep.mubr.msk.bf16.mxu1 %vm564_vm2, %v1053_v40  ;;  %v3075_v40 = vshrl.u32 %v6120_v52, 16 }
  0xe0   : > { %4963 = vmatmul.mubr.msk.bf16.gmra.mrb[4].mxu0 %vm564_vm2, %v3019_v16  ;;  %v5567_v16 = vld [vmem:[%s5669_s30 + $0x20] sm:$0xff]   ;;  %v3077_v17 = vrot.slane %v3075_v40, 2  ;;  %v3114_v40 = vshll.u32 %v6162_v43, 16 }
  0xe1   : > { %4966 = vmatprep.mubr.msk.bf16.mxu0 %vm564_vm2, %v3028_v9  ;;  %v1467_v63 = vrot.slane %v5567_v16, 1  ;;  %v3064_v9 = vsel %vm2975_vm6, %v3054_v41, %v3063_v44  ;;  %v3090_v41 = vor.u32 %v3089_v18, %v3086_v37  ;;  %v3111_v44 = vshrl.u32 %v6162_v43, 16  ;;  %v5573_v18 = vld [vmem:[%s5669_s30 + $0x50] sm:$0xff]  }
  0xe2   : > { %v3081_v49 = vor.u32 %v3080_v48, %v3077_v17  ;;  %v1475_v16 = vrot.slane %v5571_v51, 1  ;;  %v3116_v17 = vrot.slane %v3114_v40, 3  ;;  %v3125_v37 = vrot.slane %v3123_v58, 3  ;;  %v5574_v40 = vld [vmem:[%s5669_s30 + $0x58] sm:$0xff]  }
  0xe3   : > { %v1481_v39 = vrot.slane %v5574_v40, 1  ;;  %v1884_v40 = vshrl.u32 %v5964_v57, 16 }
  0xe5   : > { %4797 = vmatmul.mubr.msk.bf16.gmra.mrb[28].mxu1 %vm564_vm2, %v1055_v24  ;;  %v1466_v24 = vsel %vm1022_vm5, %v1463_v0, %v1465_v19  ;;  %v1471_v0 = vrot.slane %v5569_v10, 1  ;;  %v1479_v10 = vrot.slane %v5573_v18, 1  ;;  %v3432_v18 = vrot.slane %v6060_v28, 3 }
  0xe6   : > { %4800 = vmatprep.mubr.msk.bf16.mxu1 %vm564_vm2, %v1057_v56  ;;  %v1468_v56 = vsel %vm1022_vm5, %v1465_v19, %v1467_v63  ;;  %v3091_v19 = vsel %vm2975_vm6, %v3081_v49, %v3090_v41 }
  0xe7   : > { %v1474_v48 = vsel %vm1022_vm5, %v1471_v0, %v1473_v29  ;;  %v3433_v53 = vsel %vm3422_vm7, %v3430_v50, %v3432_v18 }
  0xe8   : > { %4967 = vmatmul.mubr.msk.bf16.gmra.mrb[8].mxu0 %vm564_vm2, %v3037_v6  ;;  %v5568_v6 = vld [vmem:[%s5669_s30 + $0x28] sm:$0xff]  }
  0xe9   : > { %4970 = vmatprep.mubr.msk.bf16.mxu0 %vm564_vm2, %v3046_v25  ;;  %v1469_v30 = vrot.slane %v5568_v6, 1  ;;  %v3082_v25 = vsel %vm2975_vm6, %v3072_v54, %v3081_v49  ;;  %v1476_v54 = vsel %vm1022_vm5, %v1473_v29, %v1475_v16  ;;  %v3129_v49 = vshrl.u32 %v6179_v14, 16 }
  0xea   : > { %v1477_v6 = vrot.slane %v5572_v11, 1  ;;  %v1489_v11 = vrot.slane %v5982_v7, 1 }
  0xeb   : > { %v3131_v45 = vrot.slane %v3129_v49, 2 }
  0xed   : > { %4801 = vmatmul.mubr.msk.bf16.gmra.mrb[32].mxu1 %vm564_vm2, %v1059_v35  ;;  %v1470_v35 = vsel %vm1022_vm5, %v1467_v63, %v1469_v30  ;;  %v3100_v63 = vsel %vm2975_vm6, %v3090_v41, %v3099_v20 }
  0xee   : > { %4806 = vmatprep.mubr.msk.bf16.mxu1 %vm564_vm2, %v1464_v27  ;;  %v3102_v27 = vshrl.u32 %v6157_v36, 16 }
  0xf0   : > { %4971 = vmatmul.mubr.msk.bf16.gmra.mrb[12].mxu0 %vm564_vm2, %v3055_v33  ;;  %v3104_v33 = vrot.slane %v3102_v27, 2 }
  0xf1   : > { %4974 = vmatprep.mubr.msk.bf16.mxu0 %vm564_vm2, %v3064_v9  ;;  %v3113_v9 = vrot.slane %v3111_v44, 2  ;;  %v3416_v44 = vld [vmem:[%s5669_s30 + $0x10] sm:$0x8] }
  0xf3   : > { %v3117_v34 = vor.u32 %v3116_v17, %v3113_v9 }
  0xf5   : > { %4807 = vmatmul.mubr.msk.bf16.vlgmr.msra.gmra.mrb[0].mxu1 %vm564_vm2, %v1466_v24  ;;  %v3108_v24 = vor.u32 %v3107_v61, %v3104_v33  ;;  %v1483_v61 = vrot.slane %v5945_v55, 1 }
  0xf6   : > { %4810 = vmatprep.mubr.msk.bf16.mxu1 %vm564_vm2, %v1468_v56  ;;  %5033 = vmatpush3.bf16.msra.mxu1 %v5651_v2  ;;  %v1472_v2 = vsel %vm1022_vm5, %v1469_v30, %v1471_v0  ;;  %v3120_v56 = vshrl.u32 %v6175_v62, 16  ;;  %v6315_v0 = vld [vmem:[%s5669_s30 + $0xa0] ss:$0 sps:$4 sm:$0x77]  }
  0xf7   : > { %v3109_v30 = vsel %vm2975_vm6, %v3099_v20, %v3108_v24  ;;  %v3138_v27 = vshrl.u32 %v6315_v0, 16  ;;  %v3141_v32 = vshll.u32 %v6315_v0, 16  ;;  %v3135_v20 = vor.u32 %v3134_v23, %v3131_v45 }
  0xf8   : > { %4975 = vmatmul.mubr.msk.bf16.gmra.mrb[16].mxu0 %vm564_vm2, %v3073_v42  ;;  %v3122_v42 = vrot.slane %v3120_v56, 2  ;;  %v1484_v17 = vsel %vm1022_vm5, %v1481_v39, %v1483_v61  ;;  %v1487_v56 = vrot.slane %v5970_v60, 1  ;;  %v1495_v45 = vrot.slane %v6002_v26, 1 }
  0xf9   : > { %4978 = vmatprep.mubr.msk.bf16.mxu0 %vm564_vm2, %v3082_v25  ;;  %v3118_v25 = vsel %vm2975_vm6, %v3108_v24, %v3117_v34  ;;  %v3143_v33 = vrot.slane %v3141_v32, 3  ;;  %v3424_v24 = vrot.slane %v6025_v38, 3  ;;  %v3426_v38 = vrot.slane %v6038_v46, 3 }
  0xfa   : > { %v3126_v41 = vor.u32 %v3125_v37, %v3122_v42  ;;  %v1490_v46 = vsel %vm1022_vm5, %v1487_v56, %v1489_v11  ;;  %v1875_v23 = vshrl.u32 %v5945_v55, 16 }
  0xfb   : > { %v3429_v42 = vsel %vm3422_vm7, %v3426_v38, %v3428_v4 }
  0xfc   : > { %v3127_v29 = vsel %vm2975_vm6, %v3117_v34, %v3126_v41  ;;  %v3136_v51 = vsel %vm2975_vm6, %v3126_v41, %v3135_v20  ;;  %v5419_v41 = vld [vmem:[%s5669_s30 + $0x98] ss:$0 sps:$4 sm:$0x11]   ;;  %v1877_v32 = vrot.slane %v1875_v23, 1 }
  0xfd   : > { %4811 = vmatmul.mubr.msk.bf16.gmra.mrb[4].mxu1 %vm564_vm2, %v1470_v35  ;;  %v1478_v35 = vsel %vm1022_vm5, %v1475_v16, %v1477_v6  ;;  %v4460_v16 = vcombine.low %v3416_v44, %v6012_v31  ;;  %v3436_v44 = vrot.slane %v6083_v1, 3 }
  0xfe   : > { %4814 = vmatprep.mubr.msk.bf16.mxu1 %vm564_vm2, %v1472_v2  ;;  %v1480_v2 = vsel %vm1022_vm5, %v1477_v6, %v1479_v10  ;;  %v3427_v6 = vsel %vm3422_vm7, %v3424_v24, %v3426_v38 }
 0x100   : > { %4979 = vmatmul.mubr.msk.bf16.gmra.mrb[20].mxu0 %vm564_vm2, %v3091_v19  ;;  %v3140_v19 = vrot.slane %v3138_v27, 2 }
 0x101   : > { %4982 = vmatprep.mubr.msk.bf16.mxu0 %vm564_vm2, %v3100_v63  ;;  %v1482_v63 = vsel %vm1022_vm5, %v1479_v10, %v1481_v39  ;;  %v1493_v10 = vrot.slane %v5998_v22, 1  ;;  %v1887_v39 = vshll.u32 %v5964_v57, 16 }
 0x102   : > { %v3144_v9 = vor.u32 %v3143_v33, %v3140_v19  ;;  %v1896_v33 = vshll.u32 %v5970_v60, 16 }
 0x103   : > { %v1496_v27 = vsel %vm1022_vm5, %v1493_v10, %v1495_v45 }
 0x104   : > { %v3145_v31 = vsel %vm2975_vm6, %v3135_v20, %v3144_v9 }
 0x105   : > { %4815 = vmatmul.mubr.msk.bf16.gmra.mrb[8].mxu1 %vm564_vm2, %v1474_v48  ;;  %v3423_v48 = vrot.slane %v4460_v16, 3  ;;  %v1889_v16 = vrot.slane %v1887_v39, 2 }
 0x106   : > { %4818 = vmatprep.mubr.msk.bf16.mxu1 %vm564_vm2, %v1476_v54  ;;  %v1485_v54 = vrot.slane %v5964_v57, 1 }
 0x107   : > { %v3425_v58 = vsel %vm3422_vm7, %v3423_v48, %v3424_v24  ;;  %v3440_v48 = vrot.slane %v6102_v8, 3  ;;  %v1902_v24 = vshrl.u32 %v5982_v7, 16 }
 0x108   : > { %4983 = vmatmul.mubr.msk.bf16.gmra.mrb[24].mxu0 %vm564_vm2, %v3109_v30  ;;  %v1486_v34 = vsel %vm1022_vm5, %v1483_v61, %v1485_v54  ;;  %v1488_v49 = vsel %vm1022_vm5, %v1485_v54, %v1487_v56  ;;  %v1491_v30 = vrot.slane %v5986_v12, 1  ;;  %v1905_v54 = vshll.u32 %v5982_v7, 16 }
 0x109   : > { %4986 = vmatprep.mubr.msk.bf16.mxu0 %vm564_vm2, %v3118_v25  ;;  %v3431_v25 = vsel %vm3422_vm7, %v3428_v4, %v3430_v50 }
 0x10a   : > { %v1492_v37 = vsel %vm1022_vm5, %v1489_v11, %v1491_v30  ;;  %v1494_v28 = vsel %vm1022_vm5, %v1491_v30, %v1493_v10  ;;  %v1907_v38 = vrot.slane %v1905_v54, 2  ;;  %v1920_v30 = vshrl.u32 %v5998_v22, 16 }
 0x10c   : > { %v1922_v10 = vrot.slane %v1920_v30, 1 }
 0x10d   : > { %4819 = vmatmul.mubr.msk.bf16.gmra.mrb[12].mxu1 %vm564_vm2, %v1478_v35  ;;  %v1878_v35 = vshll.u32 %v5945_v55, 16  ;;  %v1497_v55 = vrot.slane %v5419_v41, 1  ;;  %v1941_v41 = vshll.u32 %v6018_v59, 16 }
 0x10e   : > { %4822 = vmatprep.mubr.msk.bf16.mxu1 %vm564_vm2, %v1480_v2  ;;  %v3434_v2 = vrot.slane %v6079_v3, 3  ;;  %v1893_v3 = vshrl.u32 %v5970_v60, 16 }
 0x10f   : > { %v1880_v20 = vrot.slane %v1878_v35, 2  ;;  %v1498_v1 = vsel %vm1022_vm5, %v1495_v45, %v1497_v55  ;;  %v3446_v45 = vrot.slane %v6135_v5, 3 }
 0x110   : > { %4987 = vmatmul.mubr.msk.bf16.gmra.mrb[28].mxu0 %vm564_vm2, %v3127_v29  ;;  %v3435_v29 = vsel %vm3422_vm7, %v3432_v18, %v3434_v2  ;;  %v3437_v61 = vsel %vm3422_vm7, %v3434_v2, %v3436_v44  ;;  %v1895_v9 = vrot.slane %v1893_v3, 1  ;;  %v3456_v3 = vrot.slane %v6179_v14, 3 }
 0x111   : > { %4990 = vmatprep.mubr.msk.bf16.mxu0 %vm564_vm2, %v3136_v51  ;;  %v1881_v19 = vor.u32 %v1880_v20, %v1877_v32  ;;  %v1886_v51 = vrot.slane %v1884_v40, 1  ;;  %v3452_v40 = vrot.slane %v6162_v43, 3 }
 0x113   : > { %v1882_v57 = vsel %vm1775_vm3, %v5859_v15, %v1881_v19  ;;  %v1890_v60 = vor.u32 %v1889_v16, %v1886_v51  ;;  %v1914_v15 = vshll.u32 %v5986_v12, 16 }
 0x115   : > { %4823 = vmatmul.mubr.msk.bf16.gmra.mrb[16].mxu1 %vm564_vm2, %v1482_v63  ;;  %v3438_v63 = vrot.slane %v6097_v13, 3  ;;  %v1911_v13 = vshrl.u32 %v5986_v12, 16  ;;  %v1891_v8 = vsel %vm1775_vm3, %v1881_v19, %v1890_v60  ;;  %v1916_v11 = vrot.slane %v1914_v15, 2 }
 0x116   : > { %4826 = vmatprep.mubr.msk.bf16.mxu1 %vm564_vm2, %v1484_v17  ;;  %v1898_v17 = vrot.slane %v1896_v33, 2 }
 0x117   : > { %v1913_v4 = vrot.slane %v1911_v13, 1 }
 0x118   : > { %4991 = vmatmul.mubr.msk.bf16.gmra.mrb[32].mxu0 %vm564_vm2, %v3145_v31  ;;  %v3439_v31 = vsel %vm3422_vm7, %v3436_v44, %v3438_v63  ;;  %v1899_v56 = vor.u32 %v1898_v17, %v1895_v9  ;;  %v3450_v44 = vrot.slane %v6157_v36, 3  ;;  %v3454_v36 = vrot.slane %v6175_v62, 3 }
 0x119   : > { %4996 = vmatprep.mubr.msk.bf16.mxu0 %vm564_vm2, %v3425_v58  ;;  %v3441_v58 = vsel %vm3422_vm7, %v3438_v63, %v3440_v48  ;;  %v1917_v50 = vor.u32 %v1916_v11, %v1913_v4  ;;  %v6476_v11 = vld [vmem:[%s6806_s3] ss:$0 sm:$0xff] }
 0x11a   : > { %v1900_v7 = vsel %vm1775_vm3, %v1890_v60, %v1899_v56  ;;  %v3455_v43 = vsel %vm3422_vm7, %v3452_v40, %v3454_v36  ;;  %v3457_v33 = vsel %vm3422_vm7, %v3454_v36, %v3456_v3 }
 0x11d   : > { %4827 = vmatmul.mubr.msk.bf16.gmra.mrb[20].mxu1 %vm564_vm2, %v1486_v34  ;;  %v1904_v34 = vrot.slane %v1902_v24, 1 }
 0x11e   : > { %4830 = vmatprep.mubr.msk.bf16.mxu1 %vm564_vm2, %v1488_v49  ;;  %v3442_v49 = vrot.slane %v6115_v47, 3  ;;  %v1929_v47 = vshrl.u32 %v6002_v26, 16 }
 0x11f   : > { %v1908_v12 = vor.u32 %v1907_v38, %v1904_v34 }
 0x120   : > { %4997 = vmatmul.mubr.msk.bf16.vlgmr.msra.gmra.mrb[0].mxu0 %vm564_vm2, %v3427_v6  ;;  %v3444_v6 = vrot.slane %v6120_v52, 3  ;;  %v1931_v23 = vrot.slane %v1929_v47, 1 }
 0x121   : > { %5000 = vmatprep.mubr.msk.bf16.mxu0 %vm564_vm2, %v3429_v42  ;;  %v1923_v42 = vshll.u32 %v5998_v22, 16  ;;  %v1909_v52 = vsel %vm1775_vm3, %v1899_v56, %v1908_v12  ;;  %v1918_v22 = vsel %vm1775_vm3, %v1908_v12, %v1917_v50 }
 0x122   : > { %v3445_v18 = vsel %vm3422_vm7, %v3442_v49, %v3444_v6  ;;  %v3447_v2 = vsel %vm3422_vm7, %v3444_v6, %v3446_v45 }
 0x125   : > { %4831 = vmatmul.mubr.msk.bf16.gmra.mrb[24].mxu1 %vm564_vm2, %v1490_v46  ;;  %v3443_v46 = vsel %vm3422_vm7, %v3440_v48, %v3442_v49  ;;  %v6471_v49 = vld [vmem:[%s6805_s2] ss:$0 sm:$0xff] }
 0x126   : > { %4834 = vmatprep.mubr.msk.bf16.mxu1 %vm564_vm2, %v1492_v37  ;;  %v1932_v37 = vshll.u32 %v6002_v26, 16 }
 0x128   : > { %5001 = vmatmul.mubr.msk.bf16.gmra.mrb[4].mxu0 %vm564_vm2, %v3431_v25  ;;  %v1925_v25 = vrot.slane %v1923_v42, 2  ;;  %v1934_v35 = vrot.slane %v1932_v37, 2 }
 0x129   : > { %5004 = vmatprep.mubr.msk.bf16.mxu0 %vm564_vm2, %v3433_v53  ;;  %v3448_v53 = vrot.slane %v6144_v21, 3  ;;  %v1943_v21 = vrot.slane %v1941_v41, 2 }
 0x12a   : > { %v1926_v26 = vor.u32 %v1925_v25, %v1922_v10 }
 0x12b   : > { %v3449_v5 = vsel %vm3422_vm7, %v3446_v45, %v3448_v53  ;;  %v3451_v39 = vsel %vm3422_vm7, %v3448_v53, %v3450_v44 }
 0x12c   : > { %v1927_v32 = vsel %vm1775_vm3, %v1917_v50, %v1926_v26 }
 0x12d   : > { %4835 = vmatmul.mubr.msk.bf16.gmra.mrb[28].mxu1 %vm564_vm2, %v1494_v28  ;;  %v1938_v28 = vshrl.u32 %v6018_v59, 16 }
 0x12e   : > { %4838 = vmatprep.mubr.msk.bf16.mxu1 %vm564_vm2, %v1496_v27  ;;  %v1935_v27 = vor.u32 %v1934_v35, %v1931_v23 }
 0x12f   : > { %v1940_v20 = vrot.slane %v1938_v28, 1 }
 0x130   : > { %5005 = vmatmul.mubr.msk.bf16.gmra.mrb[8].mxu0 %vm564_vm2, %v3435_v29  ;;  %v1936_v55 = vsel %vm1775_vm3, %v1926_v26, %v1935_v27  ;;  %v3453_v29 = vsel %vm3422_vm7, %v3450_v44, %v3452_v40 }
 0x131   : > { %5008 = vmatprep.mubr.msk.bf16.mxu0 %vm564_vm2, %v3437_v61  ;;  %v1944_v59 = vor.u32 %v1943_v21, %v1940_v20  ;;  %v3458_v61 = vrot.slane %v6315_v0, 3 }
 0x133   : > { %v1945_v19 = vsel %vm1775_vm3, %v1935_v27, %v1944_v59 }
 0x135   : > { %4839 = vmatmul.mubr.msk.bf16.gmra.mrb[32].mxu1 %vm564_vm2, %v1498_v1  ;;  %v3459_v1 = vsel %vm3422_vm7, %v3456_v3, %v3458_v61 }
 0x136   : > { %4864 = vmatprep.mubr.msk.bf16.mxu1 %vm564_vm2, %v1882_v57 }
 0x138   : > { %5009 = vmatmul.mubr.msk.bf16.gmra.mrb[12].mxu0 %vm564_vm2, %v3439_v31 }
 0x139   : > { %5012 = vmatprep.mubr.msk.bf16.mxu0 %vm564_vm2, %v3441_v58 }
 0x13d   : > { %4865 = vmatmul.mubr.msk.bf16.vlgmr.msra.gmra.mrb[20].mxu1 %vm564_vm2, %v1891_v8 }
 0x13e   : > { %4868 = vmatprep.mubr.msk.bf16.mxu1 %vm564_vm2, %v1900_v7 }
 0x140   : > { %5013 = vmatmul.mubr.msk.bf16.gmra.mrb[16].mxu0 %vm564_vm2, %v3443_v46 }
 0x141   : > { %5016 = vmatprep.mubr.msk.bf16.mxu0 %vm564_vm2, %v3445_v18 }
 0x145   : > { %4869 = vmatmul.mubr.msk.bf16.gmra.mrb[24].mxu1 %vm564_vm2, %v1909_v52 }
 0x146   : > { %4872 = vmatprep.mubr.msk.bf16.mxu1 %vm564_vm2, %v1918_v22 }
 0x148   : > { %5017 = vmatmul.mubr.msk.bf16.gmra.mrb[20].mxu0 %vm564_vm2, %v3447_v2 }
 0x149   : > { %5020 = vmatprep.mubr.msk.bf16.mxu0 %vm564_vm2, %v3449_v5 }
 0x14d   : > { %4873 = vmatmul.mubr.msk.bf16.gmra.mrb[28].mxu1 %vm564_vm2, %v1927_v32 }
 0x14e   : > { %4876 = vmatprep.mubr.msk.bf16.mxu1 %vm564_vm2, %v1936_v55 }
 0x150   : > { %5021 = vmatmul.mubr.msk.bf16.gmra.mrb[24].mxu0 %vm564_vm2, %v3451_v39 }
 0x151   : > { %5024 = vmatprep.mubr.msk.bf16.mxu0 %vm564_vm2, %v3453_v29 }
 0x155   : > { %4877 = vmatmul.mubr.msk.bf16.gmra.mrb[32].mxu1 %vm564_vm2, %v1945_v19 }
 0x158   : > { %5025 = vmatmul.mubr.msk.bf16.gmra.mrb[28].mxu0 %vm564_vm2, %v3455_v43 }
 0x159   : > { %5028 = vmatprep.mubr.msk.bf16.mxu0 %vm564_vm2, %v3457_v33 }
 0x160   : > { %5029 = vmatmul.mubr.msk.bf16.gmra.mrb[32].mxu0 %vm564_vm2, %v3459_v1 }
 0x1c8   : > { %v4808_v51 = vpop.f32.mrb[0].mxu1 }
 0x1c9   : > { %v1590_v62 = vpop.f32.mrb[1].mxu1 }
 0x1ca   : > { %v4809_v16 = vpop.f32.mrb[2].mxu1 }
 0x1cb   : > { %v1593_v14 = vpop.f32.mrb[3].mxu1 }
 0x1d0   : > { %v4812_v63 = vpop.f32.mrb[4].mxu1 }
 0x1d1   : > { %v1606_v57 = vpop.f32.mrb[5].mxu1 }
 0x1d2   : > { %v4813_v9 = vpop.f32.mrb[6].mxu1 }
 0x1d3   : > { %v1609_v17 = vpop.f32.mrb[7].mxu1 }
 0x1d8   : > { %v4816_v48 = vpop.f32.mrb[8].mxu1 }
 0x1d9   : > { %v1622_v60 = vpop.f32.mrb[9].mxu1 }
 0x1da   : > { %v6448_v24 = vpop.f32.mrb[10].mxu1 }
 0x1db   : > { %v6450_v54 = vpop.f32.mrb[11].mxu1 }
 0x1e0   : > { %v6452_v31 = vpop.f32.mrb[12].mxu1 }
 0x1e1   : > { %v6454_v0 = vpop.f32.mrb[13].mxu1 }
 0x1e2   : > { %v6456_v56 = vpop.f32.mrb[14].mxu1 }
 0x1e3   : > { %v6458_v13 = vpop.f32.mrb[15].mxu1 }
 0x1e8   : > { %v6460_v15 = vpop.f32.mrb[16].mxu1 }
 0x1e9   : > { %v6462_v58 = vpop.f32.mrb[17].mxu1 }
 0x1ea   : > { %v6464_v8 = vpop.f32.mrb[18].mxu1 }
 0x1eb   : > { %v6466_v34 = vpop.f32.mrb[19].mxu1 }
 0x1f3   : > { %v4998_v38 = vpop.f32.mrb[0].mxu0 }
 0x1f4   : > { %v5034_v7 = vadd.f32 %v4998_v38, %v4808_v51  ;;  %v3551_v4 = vpop.f32.mrb[1].mxu0 }
 0x1f5   : > { %v5035_v6 = vadd.f32 %v3551_v4, %v1590_v62  ;;  %v4999_v12 = vpop.f32.mrb[2].mxu0 }
 0x1f6   : > { %v3739_v30 = vmul.f32 %v5034_v7, %v6471_v49  ;;  %v5036_v42 = vadd.f32 %v4999_v12, %v4809_v16  ;;  %v3554_v46 = vpop.f32.mrb[3].mxu0 }
 0x1f7   : > { %v3737_v50 = vmul.f32 %v5035_v6, %v6471_v49  ;;  %v5037_v47 = vadd.f32 %v3554_v46, %v1593_v14 }
 0x1f8   : > { %v6481_v37 = vadd.f32 %v6476_v11, %v3739_v30  ;;  %v3740_v18 = vmul.f32 %v5036_v42, %v6471_v49 }
 0x1f9   : > { %v6485_v52 = vadd.f32 %v6476_v11, %v3737_v50  ;;  %v3738_v10 = vmul.f32 %v5037_v47, %v6471_v49 }
 0x1fa   : > { %v4483_v25 = vmul.f32 -1.442695, %v6481_v37  ;;  %v6490_v45 = vadd.f32 %v6476_v11, %v3740_v18 }
 0x1fb   : > { %v4481_v22 = vmul.f32 -1.442695, %v6485_v52  ;;  %v6494_v23 = vadd.f32 %v6476_v11, %v3738_v10  ;;  %v5002_v35 = vpop.f32.mrb[4].mxu0 }
 0x1fc   : > { %5420 = vpow2.f32 %v4483_v25  ;;  %v4484_v53 = vmul.f32 -1.442695, %v6490_v45  ;;  %v5038_v26 = vadd.f32 %v5002_v35, %v4812_v63  ;;  %v3567_v28 = vpop.f32.mrb[5].mxu0 }
 0x1fd   : > { %5422 = vpow2.f32 %v4481_v22  ;;  %v4482_v41 = vmul.f32 -1.442695, %v6494_v23  ;;  %v5039_v2 = vadd.f32 %v3567_v28, %v1606_v57  ;;  %v5003_v27 = vpop.f32.mrb[6].mxu0 }
 0x1fe   : > { %5424 = vpow2.f32 %v4484_v53  ;;  %v3743_v5 = vmul.f32 %v5038_v26, %v6471_v49  ;;  %v5040_v32 = vadd.f32 %v5003_v27, %v4813_v9  ;;  %v3570_v20 = vpop.f32.mrb[7].mxu0 }
 0x1ff   : > { %5426 = vpow2.f32 %v4482_v41  ;;  %v3741_v21 = vmul.f32 %v5039_v2, %v6471_v49  ;;  %v5041_v44 = vadd.f32 %v3570_v20, %v1609_v17 }
 0x200   : > { %v6501_v55 = vadd.f32 %v6476_v11, %v3743_v5  ;;  %v3744_v40 = vmul.f32 %v5040_v32, %v6471_v49 }
 0x201   : > { %v6505_v59 = vadd.f32 %v6476_v11, %v3741_v21  ;;  %v3742_v39 = vmul.f32 %v5041_v44, %v6471_v49 }
 0x202   : > { %v4487_v29 = vmul.f32 -1.442695, %v6501_v55  ;;  %v6510_v19 = vadd.f32 %v6476_v11, %v3744_v40 }
 0x203   : > { %v4485_v36 = vmul.f32 -1.442695, %v6505_v59  ;;  %v6514_v3 = vadd.f32 %v6476_v11, %v3742_v39  ;;  %v5006_v43 = vpop.f32.mrb[8].mxu0 }
 0x204   : > { %5428 = vpow2.f32 %v4487_v29  ;;  %v4488_v33 = vmul.f32 -1.442695, %v6510_v19  ;;  %v5042_v61 = vadd.f32 %v5006_v43, %v4816_v48  ;;  %v3583_v1 = vpop.f32.mrb[9].mxu0 }
 0x205   : > { %5430 = vpow2.f32 %v4485_v36  ;;  %v4486_v51 = vmul.f32 -1.442695, %v6514_v3  ;;  %v5043_v62 = vadd.f32 %v3583_v1, %v1622_v60  ;;  %v5007_v16 = vpop.f32.mrb[10].mxu0 }
 0x206   : > { %v5421_v14 = vpop.eup %5420  ;;  %5432 = vpow2.f32 %v4488_v33  ;;  %v3747_v63 = vmul.f32 %v5042_v61, %v6471_v49  ;;  %v5044_v57 = vadd.f32 %v5007_v16, %v6448_v24  ;;  %v3586_v9 = vpop.f32.mrb[11].mxu0 }
 0x207   : > { %v5423_v17 = vpop.eup %5422  ;;  %v3926_v38 = vadd.f32 1.0, %v5421_v14  ;;  %5434 = vpow2.f32 %v4486_v51  ;;  %v3745_v7 = vmul.f32 %v5043_v62, %v6471_v49  ;;  %v5045_v48 = vadd.f32 %v3586_v9, %v6450_v54 }
 0x208   : > { %v5425_v4 = vpop.eup %5424  ;;  %v3924_v6 = vadd.f32 1.0, %v5423_v17  ;;  %v6523_v12 = vadd.f32 %v6476_v11, %v3747_v63  ;;  %v3748_v60 = vmul.f32 %v5044_v57, %v6471_v49 }
 0x209   : > { %v5427_v30 = vpop.eup %5426  ;;  %5436 = vrcp.f32 %v3926_v38  ;;  %v3927_v42 = vadd.f32 1.0, %v5425_v4  ;;  %v6527_v24 = vadd.f32 %v6476_v11, %v3745_v7  ;;  %v3746_v46 = vmul.f32 %v5045_v48, %v6471_v49 }
 0x20a   : > { %5438 = vrcp.f32 %v3924_v6  ;;  %v3925_v50 = vadd.f32 1.0, %v5427_v30  ;;  %v4491_v47 = vmul.f32 -1.442695, %v6523_v12  ;;  %v6532_v54 = vadd.f32 %v6476_v11, %v3748_v60 }
 0x20b   : > { %5440 = vrcp.f32 %v3927_v42  ;;  %v4489_v18 = vmul.f32 -1.442695, %v6527_v24  ;;  %v6536_v10 = vadd.f32 %v6476_v11, %v3746_v46  ;;  %v5010_v25 = vpop.f32.mrb[12].mxu0 }
 0x20c   : > { %5442 = vrcp.f32 %v3925_v50  ;;  %v4492_v22 = vmul.f32 -1.442695, %v6532_v54  ;;  %v5046_v35 = vadd.f32 %v5010_v25, %v6452_v31  ;;  %v3599_v53 = vpop.f32.mrb[13].mxu0 }
 0x20d   : > { %5444 = vpow2.f32 %v4491_v47  ;;  %v4490_v26 = vmul.f32 -1.442695, %v6536_v10  ;;  %v5047_v28 = vadd.f32 %v3599_v53, %v6454_v0  ;;  %v5011_v41 = vpop.f32.mrb[14].mxu0 }
 0x20e   : > { %v5429_v2 = vpop.eup %5428  ;;  %5446 = vpow2.f32 %v4489_v18  ;;  %v3751_v27 = vmul.f32 %v5046_v35, %v6471_v49  ;;  %v5048_v5 = vadd.f32 %v5011_v41, %v6456_v56  ;;  %v3602_v32 = vpop.f32.mrb[15].mxu0 }
 0x20f   : > { %v5431_v21 = vpop.eup %5430  ;;  %v3930_v44 = vadd.f32 1.0, %v5429_v2  ;;  %5448 = vpow2.f32 %v4492_v22  ;;  %v3749_v31 = vmul.f32 %v5047_v28, %v6471_v49  ;;  %v5049_v40 = vadd.f32 %v3602_v32, %v6458_v13 }
 0x210   : > { %v6544_v20 = vpop.f32.mrb[20].mxu1  ;;  %v5433_v0 = vpop.eup %5432  ;;  %v3928_v29 = vadd.f32 1.0, %v5431_v21  ;;  %5450 = vpow2.f32 %v4490_v26  ;;  %v6552_v36 = vadd.f32 %v6476_v11, %v3751_v27  ;;  %v3752_v56 = vmul.f32 %v5048_v5, %v6471_v49 }
 0x211   : > { %v6549_v39 = vpop.f32.mrb[21].mxu1  ;;  %v5435_v33 = vpop.eup %5434  ;;  %5452 = vrcp.f32 %v3930_v44  ;;  %v3931_v61 = vadd.f32 1.0, %v5433_v0  ;;  %v6558_v1 = vadd.f32 %v6476_v11, %v3749_v31  ;;  %v3750_v13 = vmul.f32 %v5049_v40, %v6471_v49 }
 0x212   : > { %v6555_v43 = vpop.f32.mrb[22].mxu1  ;;  %5454 = vrcp.f32 %v3928_v29  ;;  %v3929_v62 = vadd.f32 1.0, %v5435_v33  ;;  %v4495_v16 = vmul.f32 -1.442695, %v6552_v36  ;;  %v6565_v14 = vadd.f32 %v6476_v11, %v3752_v56 }
 0x213   : > { %v6561_v51 = vpop.f32.mrb[23].mxu1  ;;  %v5437_v63 = vpop.eup %5436  ;;  %5456 = vrcp.f32 %v3931_v61  ;;  %v4493_v57 = vmul.f32 -1.442695, %v6558_v1  ;;  %v6574_v9 = vadd.f32 %v6476_v11, %v3750_v13 }
 0x214   : > { %v5014_v17 = vpop.f32.mrb[16].mxu0  ;;  %v5439_v38 = vpop.eup %5438  ;;  %v4034_v7 = vmul.f32 %v5437_v63, %v6481_v37  ;;  %5458 = vrcp.f32 %v3929_v62  ;;  %v4496_v48 = vmul.f32 -1.442695, %v6565_v14 }
 0x215   : > { %v5050_v4 = vadd.f32 %v5014_v17, %v6460_v15  ;;  %v3615_v6 = vpop.f32.mrb[17].mxu0  ;;  %v5441_v60 = vpop.eup %5440  ;;  %v4032_v30 = vmul.f32 %v5439_v38, %v6485_v52  ;;  %5460 = vpow2.f32 %v4495_v16  ;;  %v4494_v42 = vmul.f32 -1.442695, %v6574_v9 }
 0x216   : > { %v5051_v46 = vadd.f32 %v3615_v6, %v6462_v58  ;;  %v5015_v50 = vpop.f32.mrb[18].mxu0  ;;  %v5443_v47 = vpop.eup %5442  ;;  %4070 = vst [vmem:[%s6570_s27 + $0x10] sm:$0xff] %v4034_v7  ;;  %v4035_v37 = vmul.f32 %v5441_v60, %v6490_v45  ;;  %5462 = vpow2.f32 %v4493_v57 }
 0x217   : > { %v3755_v18 = vmul.f32 %v5050_v4, %v6471_v49  ;;  %v5052_v15 = vadd.f32 %v5015_v50, %v6464_v8  ;;  %v3618_v25 = vpop.f32.mrb[19].mxu0  ;;  %v5445_v52 = vpop.eup %5444  ;;  %4068 = vst [vmem:[%s6570_s27] sm:$0xff] %v4032_v30  ;;  %v4033_v35 = vmul.f32 %v5443_v47, %v6494_v23  ;;  %5464 = vpow2.f32 %v4496_v48 }
 0x218   : > { %v6586_v22 = vpop.f32.mrb[24].mxu1  ;;  %v3753_v58 = vmul.f32 %v5051_v46, %v6471_v49  ;;  %v5053_v53 = vadd.f32 %v3618_v25, %v6466_v34  ;;  %v5447_v45 = vpop.eup %5446  ;;  %4071 = vst [vmem:[%s6570_s27 + $0x18] sm:$0xff] %v4035_v37  ;;  %v3934_v28 = vadd.f32 1.0, %v5445_v52  ;;  %5466 = vpow2.f32 %v4494_v42 }
 0x219   : > { %v6592_v26 = vpop.f32.mrb[25].mxu1  ;;  %v6596_v8 = vadd.f32 %v6476_v11, %v3755_v18  ;;  %v3756_v41 = vmul.f32 %v5052_v15, %v6471_v49  ;;  %v5449_v27 = vpop.eup %5448  ;;  %4069 = vst [vmem:[%s6570_s27 + $0x8] sm:$0xff] %v4033_v35  ;;  %v3932_v23 = vadd.f32 1.0, %v5447_v45 }
 0x21a   : > { %v6599_v2 = vpop.f32.mrb[26].mxu1  ;;  %v6603_v5 = vadd.f32 %v6476_v11, %v3753_v58  ;;  %v3754_v34 = vmul.f32 %v5053_v53, %v6471_v49  ;;  %v5451_v21 = vpop.eup %5450  ;;  %5468 = vrcp.f32 %v3934_v28  ;;  %v3935_v44 = vadd.f32 1.0, %v5449_v27 }
 0x21b   : > { %v6606_v32 = vpop.f32.mrb[27].mxu1  ;;  %v4499_v31 = vmul.f32 -1.442695, %v6596_v8  ;;  %v6610_v40 = vadd.f32 %v6476_v11, %v3756_v41  ;;  %v5453_v0 = vpop.eup %5452  ;;  %5470 = vrcp.f32 %v3932_v23  ;;  %v3933_v29 = vadd.f32 1.0, %v5451_v21 }
 0x21c   : > { %v4497_v56 = vmul.f32 -1.442695, %v6603_v5  ;;  %v6614_v33 = vadd.f32 %v6476_v11, %v3754_v34  ;;  %v5018_v61 = vpop.f32.mrb[20].mxu0  ;;  %v5455_v13 = vpop.eup %5454  ;;  %v4038_v62 = vmul.f32 %v5453_v0, %v6501_v55  ;;  %5472 = vrcp.f32 %v3935_v44 }
 0x21d   : > { %v4500_v16 = vmul.f32 -1.442695, %v6610_v40  ;;  %v5054_v63 = vadd.f32 %v5018_v61, %v6544_v20  ;;  %v3631_v57 = vpop.f32.mrb[21].mxu0  ;;  %v5457_v17 = vpop.eup %5456  ;;  %v4036_v38 = vmul.f32 %v5455_v13, %v6505_v59  ;;  %5474 = vrcp.f32 %v3933_v29 }
 0x21e   : > { %v4498_v7 = vmul.f32 -1.442695, %v6614_v33  ;;  %v5055_v48 = vadd.f32 %v3631_v57, %v6549_v39  ;;  %v5019_v4 = vpop.f32.mrb[22].mxu0  ;;  %v5459_v6 = vpop.eup %5458  ;;  %4074 = vst [vmem:[%s6570_s27 + $0x30] sm:$0xff] %v4038_v62  ;;  %v4039_v55 = vmul.f32 %v5457_v17, %v6510_v19  ;;  %5476 = vpow2.f32 %v4499_v31 }
 0x21f   : > { %v3759_v60 = vmul.f32 %v5054_v63, %v6471_v49  ;;  %v5056_v20 = vadd.f32 %v5019_v4, %v6555_v43  ;;  %v3634_v30 = vpop.f32.mrb[23].mxu0  ;;  %v5461_v59 = vpop.eup %5460  ;;  %4072 = vst [vmem:[%s6570_s27 + $0x20] sm:$0xff] %v4036_v38  ;;  %v4037_v46 = vmul.f32 %v5459_v6, %v6514_v3  ;;  %5478 = vpow2.f32 %v4497_v56 }
 0x220   : > { %v6626_v42 = vpop.f32.mrb[28].mxu1  ;;  %v3757_v39 = vmul.f32 %v5055_v48, %v6471_v49  ;;  %v5057_v50 = vadd.f32 %v3634_v30, %v6561_v51  ;;  %v5463_v19 = vpop.eup %5462  ;;  %4075 = vst [vmem:[%s6570_s27 + $0x38] sm:$0xff] %v4039_v55  ;;  %v3938_v37 = vadd.f32 1.0, %v5461_v59  ;;  %5480 = vpow2.f32 %v4500_v16 }
 0x221   : > { %v6632_v47 = vpop.f32.mrb[29].mxu1  ;;  %v6636_v43 = vadd.f32 %v6476_v11, %v3759_v60  ;;  %v3760_v18 = vmul.f32 %v5056_v20, %v6471_v49  ;;  %v5465_v25 = vpop.eup %5464  ;;  %4073 = vst [vmem:[%s6570_s27 + $0x28] sm:$0xff] %v4037_v46  ;;  %v3936_v3 = vadd.f32 1.0, %v5463_v19  ;;  %5482 = vpow2.f32 %v4498_v7 }
 0x222   : > { %v6639_v15 = vpop.f32.mrb[30].mxu1  ;;  %v6643_v52 = vadd.f32 %v6476_v11, %v3757_v39  ;;  %v3758_v51 = vmul.f32 %v5057_v50, %v6471_v49  ;;  %v5467_v58 = vpop.eup %5466  ;;  %5484 = vrcp.f32 %v3938_v37  ;;  %v3939_v53 = vadd.f32 1.0, %v5465_v25 }
 0x223   : > { %v6646_v35 = vpop.f32.mrb[31].mxu1  ;;  %v4503_v45 = vmul.f32 -1.442695, %v6636_v43  ;;  %v6650_v28 = vadd.f32 %v6476_v11, %v3760_v18  ;;  %5486 = vrcp.f32 %v3936_v3  ;;  %v3937_v41 = vadd.f32 1.0, %v5467_v58  ;;  %v5022_v34 = vpop.f32.mrb[24].mxu0 }
 0x224   : > { %v4501_v27 = vmul.f32 -1.442695, %v6643_v52  ;;  %v6654_v23 = vadd.f32 %v6476_v11, %v3758_v51  ;;  %v5469_v21 = vpop.eup %5468  ;;  %5488 = vrcp.f32 %v3939_v53  ;;  %v5058_v31 = vadd.f32 %v5022_v34, %v6586_v22  ;;  %v3647_v0 = vpop.f32.mrb[25].mxu0 }
 0x225   : > { %v4504_v44 = vmul.f32 -1.442695, %v6650_v28  ;;  %v5471_v29 = vpop.eup %5470  ;;  %v4042_v56 = vmul.f32 %v5469_v21, %v6523_v12  ;;  %5490 = vrcp.f32 %v3937_v41  ;;  %v5059_v13 = vadd.f32 %v3647_v0, %v6592_v26  ;;  %v5023_v62 = vpop.f32.mrb[26].mxu0 }
 0x226   : > { %v4502_v61 = vmul.f32 -1.442695, %v6654_v23  ;;  %v5473_v16 = vpop.eup %5472  ;;  %v4040_v63 = vmul.f32 %v5471_v29, %v6527_v24  ;;  %5492 = vpow2.f32 %v4503_v45  ;;  %v3763_v57 = vmul.f32 %v5058_v31, %v6471_v49  ;;  %v3650_v17 = vpop.f32.mrb[27].mxu0 }
 0x227   : > { %v5060_v22 = vadd.f32 %v5023_v62, %v6599_v2  ;;  %v5475_v12 = vpop.eup %5474  ;;  %4078 = vst [vmem:[%s6570_s27 + $0x50] sm:$0xff] %v4042_v56  ;;  %v4043_v7 = vmul.f32 %v5473_v16, %v6532_v54  ;;  %5494 = vpow2.f32 %v4501_v27  ;;  %v3761_v26 = vmul.f32 %v5059_v13, %v6471_v49 }
 0x228   : > { %v6664_v38 = vpop.f32.mrb[32].mxu1  ;;  %v5061_v48 = vadd.f32 %v3650_v17, %v6606_v32  ;;  %v5477_v24 = vpop.eup %5476  ;;  %4076 = vst [vmem:[%s6570_s27 + $0x40] sm:$0xff] %v4040_v63  ;;  %v4041_v2 = vmul.f32 %v5475_v12, %v6536_v10  ;;  %5496 = vpow2.f32 %v4504_v44  ;;  %v6675_v6 = vadd.f32 %v6476_v11, %v3763_v57 }
 0x229   : > { %v6670_v4 = vpop.f32.mrb[33].mxu1  ;;  %v3764_v55 = vmul.f32 %v5060_v22, %v6471_v49  ;;  %v5479_v54 = vpop.eup %5478  ;;  %4079 = vst [vmem:[%s6570_s27 + $0x58] sm:$0xff] %v4043_v7  ;;  %v3942_v20 = vadd.f32 1.0, %v5477_v24  ;;  %5498 = vpow2.f32 %v4502_v61  ;;  %v6682_v32 = vadd.f32 %v6476_v11, %v3761_v26 }
 0x22a   : > { %v6678_v60 = vpop.f32.mrb[34].mxu1  ;;  %v3762_v30 = vmul.f32 %v5061_v48, %v6471_v49  ;;  %v5481_v10 = vpop.eup %5480  ;;  %4077 = vst [vmem:[%s6570_s27 + $0x48] sm:$0xff] %v4041_v2  ;;  %v3940_v46 = vadd.f32 1.0, %v5479_v54  ;;  %v4507_v39 = vmul.f32 -1.442695, %v6675_v6 }
 0x22b   : > { %v6685_v59 = vpop.f32.mrb[35].mxu1  ;;  %v6690_v50 = vadd.f32 %v6476_v11, %v3764_v55  ;;  %v5483_v19 = vpop.eup %5482  ;;  %5500 = vrcp.f32 %v3942_v20  ;;  %v3943_v37 = vadd.f32 1.0, %v5481_v10  ;;  %v4505_v18 = vmul.f32 -1.442695, %v6682_v32 }
 0x22c   : > { %v6694_v25 = vadd.f32 %v6476_v11, %v3762_v30  ;;  %v5026_v3 = vpop.f32.mrb[28].mxu0  ;;  %v5485_v51 = vpop.eup %5484  ;;  %5502 = vrcp.f32 %v3940_v46  ;;  %v3941_v58 = vadd.f32 1.0, %v5483_v19 }
 0x22d   : > { %v4508_v53 = vmul.f32 -1.442695, %v6690_v50  ;;  %v5062_v45 = vadd.f32 %v5026_v3, %v6626_v42  ;;  %v3663_v41 = vpop.f32.mrb[29].mxu0  ;;  %v5487_v27 = vpop.eup %5486  ;;  %v4046_v34 = vmul.f32 %v5485_v51, %v6552_v36  ;;  %5504 = vrcp.f32 %v3943_v37 }
 0x22e   : > { %v4506_v21 = vmul.f32 -1.442695, %v6694_v25  ;;  %v5063_v44 = vadd.f32 %v3663_v41, %v6632_v47  ;;  %v5027_v31 = vpop.f32.mrb[30].mxu0  ;;  %v5489_v0 = vpop.eup %5488  ;;  %v4044_v29 = vmul.f32 %v5487_v27, %v6558_v1  ;;  %5506 = vrcp.f32 %v3941_v58 }
 0x22f   : > { %v3767_v56 = vmul.f32 %v5062_v45, %v6471_v49  ;;  %v5064_v42 = vadd.f32 %v5027_v31, %v6639_v15  ;;  %v3666_v61 = vpop.f32.mrb[31].mxu0  ;;  %v5491_v13 = vpop.eup %5490  ;;  %4082 = vst [vmem:[%s6570_s27 + $0x70] sm:$0xff] %v4046_v34  ;;  %v4047_v36 = vmul.f32 %v5489_v0, %v6565_v14  ;;  %5508 = vpow2.f32 %v4507_v39 }
 0x230   : > { %v3765_v62 = vmul.f32 %v5063_v44, %v6471_v49  ;;  %v5065_v47 = vadd.f32 %v3666_v61, %v6646_v35  ;;  %v5493_v16 = vpop.eup %5492  ;;  %4080 = vst [vmem:[%s6570_s27 + $0x60] sm:$0xff] %v4044_v29  ;;  %v4045_v1 = vmul.f32 %v5491_v13, %v6574_v9  ;;  %5510 = vpow2.f32 %v4505_v18 }
 0x231   : > { %v6711_v63 = vadd.f32 %v6476_v11, %v3767_v56  ;;  %v3768_v15 = vmul.f32 %v5064_v42, %v6471_v49  ;;  %v5495_v57 = vpop.eup %5494  ;;  %4083 = vst [vmem:[%s6570_s27 + $0x78] sm:$0xff] %v4047_v36  ;;  %v3946_v22 = vadd.f32 1.0, %v5493_v16  ;;  %5512 = vpow2.f32 %v4508_v53 }
 0x232   : > { %v6716_v14 = vadd.f32 %v6476_v11, %v3765_v62  ;;  %v3766_v17 = vmul.f32 %v5065_v47, %v6471_v49  ;;  %v5497_v35 = vpop.eup %5496  ;;  %4081 = vst [vmem:[%s6570_s27 + $0x68] sm:$0xff] %v4045_v1  ;;  %v3944_v12 = vadd.f32 1.0, %v5495_v57  ;;  %5514 = vpow2.f32 %v4506_v21 }
 0x233   : > { %v6721_v9 = vadd.f32 %v6476_v11, %v3768_v15  ;;  %v5499_v7 = vpop.eup %5498  ;;  %5516 = vrcp.f32 %v3946_v22  ;;  %v3947_v26 = vadd.f32 1.0, %v5497_v35  ;;  %v4511_v48 = vmul.f32 -1.442695, %v6711_v63  ;;  %v5030_v2 = vpop.f32.mrb[32].mxu0 }
 0x234   : > { %v6725_v24 = vadd.f32 %v6476_v11, %v3766_v17  ;;  %5518 = vrcp.f32 %v3944_v12  ;;  %v3945_v55 = vadd.f32 1.0, %v5499_v7  ;;  %v4509_v54 = vmul.f32 -1.442695, %v6716_v14  ;;  %v3679_v30 = vpop.f32.mrb[33].mxu0 }
 0x235   : > { %v5066_v20 = vadd.f32 %v5030_v2, %v6664_v38  ;;  %v5501_v10 = vpop.eup %5500  ;;  %5520 = vrcp.f32 %v3947_v26  ;;  %v4512_v46 = vmul.f32 -1.442695, %v6721_v9  ;;  %v5067_v19 = vadd.f32 %v3679_v30, %v6670_v4  ;;  %v5031_v37 = vpop.f32.mrb[34].mxu0 }
 0x236   : > { %v4510_v39 = vmul.f32 -1.442695, %v6725_v24  ;;  %v5503_v18 = vpop.eup %5502  ;;  %v4050_v3 = vmul.f32 %v5501_v10, %v6596_v8  ;;  %5522 = vrcp.f32 %v3945_v55  ;;  %v5068_v38 = vadd.f32 %v5031_v37, %v6678_v60  ;;  %v3682_v58 = vpop.f32.mrb[35].mxu0 }
 0x237   : > { %v3771_v51 = vmul.f32 %v5066_v20, %v6471_v49  ;;  %v5505_v53 = vpop.eup %5504  ;;  %v4048_v45 = vmul.f32 %v5503_v18, %v6603_v5  ;;  %5524 = vpow2.f32 %v4511_v48  ;;  %v3769_v41 = vmul.f32 %v5067_v19, %v6471_v49 }
 0x238   : > { %v5069_v4 = vadd.f32 %v3682_v58, %v6685_v59  ;;  %v5507_v27 = vpop.eup %5506  ;;  %4086 = vst [vmem:[%s6570_s27 + $0x90] sm:$0xff] %v4050_v3  ;;  %v4051_v8 = vmul.f32 %v5505_v53, %v6610_v40  ;;  %5526 = vpow2.f32 %v4509_v54  ;;  %v3772_v60 = vmul.f32 %v5068_v38, %v6471_v49 }
 0x239   : > { %v6741_v34 = vadd.f32 %v6476_v11, %v3771_v51  ;;  %v5509_v21 = vpop.eup %5508  ;;  %4084 = vst [vmem:[%s6570_s27 + $0x80] sm:$0xff] %v4048_v45  ;;  %v4049_v5 = vmul.f32 %v5507_v27, %v6614_v33  ;;  %5528 = vpow2.f32 %v4512_v46  ;;  %v6747_v44 = vadd.f32 %v6476_v11, %v3769_v41 }
 0x23a   : > { %v3770_v59 = vmul.f32 %v5069_v4, %v6471_v49  ;;  %v5511_v31 = vpop.eup %5510  ;;  %4087 = vst [vmem:[%s6570_s27 + $0x98] sm:$0xff] %v4051_v8  ;;  %v3950_v40 = vadd.f32 1.0, %v5509_v21  ;;  %5530 = vpow2.f32 %v4510_v39  ;;  %v6752_v0 = vadd.f32 %v6476_v11, %v3772_v60 }
 0x23b   : > { %v5513_v29 = vpop.eup %5512  ;;  %4085 = vst [vmem:[%s6570_s27 + $0x88] sm:$0xff] %v4049_v5  ;;  %v3948_v56 = vadd.f32 1.0, %v5511_v31  ;;  %v4515_v13 = vmul.f32 -1.442695, %v6741_v34  ;;  %v4513_v62 = vmul.f32 -1.442695, %v6747_v44 }
 0x23c   : > { %v6756_v42 = vadd.f32 %v6476_v11, %v3770_v59  ;;  %v5515_v33 = vpop.eup %5514  ;;  %5532 = vrcp.f32 %v3950_v40  ;;  %v3951_v61 = vadd.f32 1.0, %v5513_v29  ;;  %v4516_v11 = vmul.f32 -1.442695, %v6752_v0 }
 0x23d   : > { %v5517_v49 = vpop.eup %5516  ;;  %5534 = vrcp.f32 %v3948_v56  ;;  %v3949_v36 = vadd.f32 1.0, %v5515_v33 }
 0x23e   : > { %v5519_v47 = vpop.eup %5518  ;;  %v4054_v16 = vmul.f32 %v5517_v49, %v6636_v43  ;;  %5536 = vrcp.f32 %v3951_v61  ;;  %v4514_v57 = vmul.f32 -1.442695, %v6756_v42 }
 0x23f   : > { %v5521_v1 = vpop.eup %5520  ;;  %v4052_v15 = vmul.f32 %v5519_v47, %v6643_v52  ;;  %5538 = vrcp.f32 %v3949_v36 }
 0x240   : > { %v5523_v22 = vpop.eup %5522  ;;  %4090 = vst [vmem:[%s6570_s27 + $0xb0] sm:$0xff] %v4054_v16  ;;  %v4055_v17 = vmul.f32 %v5521_v1, %v6650_v28  ;;  %5540 = vpow2.f32 %v4515_v13 }
 0x241   : > { %v5525_v35 = vpop.eup %5524  ;;  %4088 = vst [vmem:[%s6570_s27 + $0xa0] sm:$0xff] %v4052_v15  ;;  %v4053_v43 = vmul.f32 %v5523_v22, %v6654_v23  ;;  %5542 = vpow2.f32 %v4513_v62 }
 0x242   : > { %v5527_v12 = vpop.eup %5526  ;;  %4091 = vst [vmem:[%s6570_s27 + $0xb8] sm:$0xff] %v4055_v17  ;;  %v3954_v7 = vadd.f32 1.0, %v5525_v35  ;;  %5544 = vpow2.f32 %v4516_v11 }
 0x243   : > { %v5529_v26 = vpop.eup %5528  ;;  %4089 = vst [vmem:[%s6570_s27 + $0xa8] sm:$0xff] %v4053_v43  ;;  %v3952_v52 = vadd.f32 1.0, %v5527_v12  ;;  %5546 = vpow2.f32 %v4514_v57 }
 0x244   : > { %v5531_v48 = vpop.eup %5530  ;;  %5548 = vrcp.f32 %v3954_v7  ;;  %v3955_v2 = vadd.f32 1.0, %v5529_v26 }
 0x245   : > { %5550 = vrcp.f32 %v3952_v52  ;;  %v3953_v28 = vadd.f32 1.0, %v5531_v48 }
 0x246   : > { %v5533_v55 = vpop.eup %5532  ;;  %5552 = vrcp.f32 %v3955_v2 }
 0x247   : > { %v5535_v23 = vpop.eup %5534  ;;  %v4058_v54 = vmul.f32 %v5533_v55, %v6675_v6  ;;  %5554 = vrcp.f32 %v3953_v28 }
 0x248   : > { %v5537_v20 = vpop.eup %5536  ;;  %v4056_v30 = vmul.f32 %v5535_v23, %v6682_v32 }
 0x249   : > { %v5539_v10 = vpop.eup %5538  ;;  %4094 = vst [vmem:[%s6570_s27 + $0xd0] sm:$0xff] %v4058_v54  ;;  %v4059_v46 = vmul.f32 %v5537_v20, %v6690_v50 }
 0x24a   : > { %v5541_v39 = vpop.eup %5540  ;;  %4092 = vst [vmem:[%s6570_s27 + $0xc0] sm:$0xff] %v4056_v30  ;;  %v4057_v19 = vmul.f32 %v5539_v10, %v6694_v25 }
 0x24b   : > { %v5543_v37 = vpop.eup %5542  ;;  %4095 = vst [vmem:[%s6570_s27 + $0xd8] sm:$0xff] %v4059_v46  ;;  %v3958_v18 = vadd.f32 1.0, %v5541_v39 }
 0x24c   : > { %v5545_v3 = vpop.eup %5544  ;;  %4093 = vst [vmem:[%s6570_s27 + $0xc8] sm:$0xff] %v4057_v19  ;;  %v3956_v51 = vadd.f32 1.0, %v5543_v37 }
 0x24d   : > { %v5547_v6 = vpop.eup %5546  ;;  %5556 = vrcp.f32 %v3958_v18  ;;  %v3959_v32 = vadd.f32 1.0, %v5545_v3 }
 0x24e   : > { %v5549_v38 = vpop.eup %5548  ;;  %5558 = vrcp.f32 %v3956_v51  ;;  %v3957_v50 = vadd.f32 1.0, %v5547_v6 }
 0x24f   : > { %v5551_v58 = vpop.eup %5550  ;;  %v4062_v53 = vmul.f32 %v5549_v38, %v6711_v63  ;;  %5560 = vrcp.f32 %v3959_v32 }
 0x250   : > { %v5553_v25 = vpop.eup %5552  ;;  %v4060_v45 = vmul.f32 %v5551_v58, %v6716_v14  ;;  %5562 = vrcp.f32 %v3957_v50 }
 0x251   : > { %v5555_v41 = vpop.eup %5554  ;;  %4098 = vst [vmem:[%s6570_s27 + $0xf0] sm:$0xff] %v4062_v53  ;;  %v4063_v4 = vmul.f32 %v5553_v25, %v6721_v9 }
 0x252   : > { %4096 = vst [vmem:[%s6570_s27 + $0xe0] sm:$0xff] %v4060_v45  ;;  %v4061_v27 = vmul.f32 %v5555_v41, %v6725_v24 }
 0x253   : > { %4099 = vst [vmem:[%s6570_s27 + $0xf8] sm:$0xff] %v4063_v4 }
 0x254   : > { %4097 = vst [vmem:[%s6570_s27 + $0xe8] sm:$0xff] %v4061_v27 }
 0x257   : > { %v5557_v8 = vpop.eup %5556 }
 0x258   : > { %v5559_v63 = vpop.eup %5558  ;;  %v4066_v60 = vmul.f32 %v5557_v8, %v6741_v34 }
 0x259   : > { %v5561_v21 = vpop.eup %5560  ;;  %v4064_v14 = vmul.f32 %v5559_v63, %v6747_v44 }
 0x25a   : > { %v5563_v5 = vpop.eup %5562  ;;  %4102 = vst [vmem:[%s6570_s27 + $0x110] sm:$0xff] %v4066_v60  ;;  %v4067_v59 = vmul.f32 %v5561_v21, %v6752_v0 }
 0x25b   : > { %4100 = vst [vmem:[%s6570_s27 + $0x100] sm:$0xff] %v4064_v14  ;;  %v4065_v9 = vmul.f32 %v5563_v5, %v6756_v42 }
 0x25c   : > { %4103 = vst [vmem:[%s6570_s27 + $0x118] sm:$0xff] %v4067_v59 }
 0x25d   : > { %4101 = vst [vmem:[%s6570_s27 + $0x108] sm:$0xff] %v4065_v9 }
 0x25e PF: > { %s14_s17 = sadd.s32 1, %s5597_s17   ;;  %s6808_s15 = smov %s5593_s16 }
 0x25f   : > { %p11_p5 = scmp.ge.s32.totalorder %s14_s17, 4   ;;  %s6809_s16 = smov %s6811_s18 }
 0x261   :  { %13 = sbr.rel (!%p11_p5) target bundleno = 2 (0x2), region = 83 }

</bundles_post_ra>
